<compile_context>
chip_gen: v7x
topology: tpu7x:2x2x1
jax: 0.10.0
libtpu: 0.0.40
codegen_flags: <defaults>
</compile_context>

<pallas_src>
import functools

import jax
import jax.numpy as jnp
from jax.experimental import pallas as pl
from jax.experimental.pallas import tpu as pltpu

HIDDEN = 512          # fixed by the module (fc1 output / fc2 input)
EPS = 1e-12           # F.normalize default eps


def _round_up(x, m):
    return ((x + m - 1) // m) * m


def _predictor_deep_kernel(x_ref, w1_ref, b1_ref, w2_ref, o_ref, *, inv_temp):
    # fc1: (tm, inc) @ (inc, HIDDEN) + (1, HIDDEN)              -- MXU
    h = jnp.dot(x_ref[...], w1_ref[...], preferred_element_type=jnp.float32)
    h = h + b1_ref[...]

    # F.normalize(p=2, dim=1): row / max(||row||, eps).
    #   1 / max(sqrt(s), eps) == rsqrt(max(s, eps^2))   (monotone, s >= 0)
    # Row-sum goes to the XLU, rsqrt to the EUP -> hides under the fc2 matmul.
    sumsq = jnp.sum(h * h, axis=-1, keepdims=True)
    hn = h * jax.lax.rsqrt(jnp.maximum(sumsq, EPS * EPS))

    # fc2 (no bias) followed by temperature scaling              -- MXU + VPU
    logits = jnp.dot(hn, w2_ref[...], preferred_element_type=jnp.float32)
    o_ref[...] = (logits * inv_temp).astype(o_ref.dtype)


def predictor_deep_forward(x, w1_t, b1, w2_t, *, temp=0.05, tm=None,
                           slice_output=True):
    """Forward pass of Predictor_deep.

    x: (N, inc) f32; w1_t: (inc, HIDDEN); b1: (HIDDEN,); w2_t: (HIDDEN, C).
    Returns (N, C) logits, or the zero-padded lane-dense
    (N, round_up(C, 128)) slab when slice_output=False (lets a fused consumer
    skip an HBM round trip).
    """
    n, inc = x.shape
    num_class = w2_t.shape[1]

    if tm is None:
        # Biggest tile that fills the MXU M dimension; a single grid step when
        # the whole batch fits (grid steps are a sequential loop on one TC, so
        # splitting a small batch is pure per-step overhead).
        tm = min(256, _round_up(n, 8))

    # Pad the batch to a multiple of tm; padded rows are sliced off at the end
    # (the eps clamp keeps the normalize finite for the all-zero pad rows).
    grid_m = pl.cdiv(n, tm)
    n_pad = grid_m * tm
    if n_pad != n:
        x = jnp.pad(x, ((0, n_pad - n), (0, 0)))

    # Pad the class dimension to a multiple of 128 for a lane-dense output.
    c_pad = _round_up(num_class, 128)
    if c_pad != num_class:
        w2_t = jnp.pad(w2_t, ((0, 0), (0, c_pad - num_class)))

    b1_2d = b1.reshape(1, HIDDEN)

    kernel = functools.partial(_predictor_deep_kernel,
                               inv_temp=1.0 / float(temp))

    # VMEM working set (f32, Pallas double-buffers): 2*tm*inc (x tiles)
    # + 2*inc*HIDDEN (W1) + 2*HIDDEN*c_pad (W2) + 2*tm*c_pad (out) -- a few
    # MiB at the module's default inc=512, far under the scoped limit.
    # TODO(synk): for very large inc, add a K-tile grid axis for the fc1
    # contraction (accumulate h in VMEM scratch, normalize+fc2 under pl.when
    # on the last k step) instead of keeping W1 fully resident.
    out = pl.pallas_call(
        kernel,
        out_shape=jax.ShapeDtypeStruct((n_pad, c_pad), jnp.float32),
        grid_spec=pltpu.PrefetchScalarGridSpec(
            num_scalar_prefetch=0,
            grid=(grid_m,),
            in_specs=[
                pl.BlockSpec((tm, inc), lambda i: (i, 0)),        # x tile
                pl.BlockSpec((inc, HIDDEN), lambda i: (0, 0)),    # W1^T (resident)
                pl.BlockSpec((1, HIDDEN), lambda i: (0, 0)),      # b1
                pl.BlockSpec((HIDDEN, c_pad), lambda i: (0, 0)),  # W2^T (resident)
            ],
            out_specs=pl.BlockSpec((tm, c_pad), lambda i: (i, 0)),
        ),
        compiler_params=pltpu.CompilerParams(
            dimension_semantics=("parallel",),
        ),
    )(x, w1_t, b1_2d, w2_t)

    if n_pad != n:
        out = out[:n]
    if slice_output and c_pad != num_class:
        out = out[:, :num_class]
    return out


def init_params(key, inc, num_class):
    """Deterministic synthetic parameters (shapes match nn.Linear in __init__)."""
    k1, k2, k3 = jax.random.split(key, 3)
    # nn.Linear(inc, 512): weight (512, inc), bias (512,). Stored transposed.
    bound1 = 1.0 / jnp.sqrt(inc)
    w1 = jax.random.uniform(k1, (HIDDEN, inc), jnp.float32, -bound1, bound1)
    b1 = jax.random.uniform(k2, (HIDDEN,), jnp.float32, -bound1, bound1)
    # nn.Linear(512, num_class, bias=False): weight (num_class, 512).
    bound2 = 1.0 / jnp.sqrt(HIDDEN)
    w2 = jax.random.uniform(k3, (num_class, HIDDEN), jnp.float32, -bound2, bound2)
    return w1.T, b1, w2.T  # (inc, HIDDEN), (HIDDEN,), (HIDDEN, num_class)


def reference_forward(x, w1_t, b1, w2_t, temp=0.05):
    h = x @ w1_t + b1
    norm = jnp.maximum(jnp.linalg.norm(h, axis=1, keepdims=True), EPS)
    return (h / norm) @ w2_t / temp


# TODO(synk): the `reverse=True` path uses grad_reverse (custom autograd op);
# it is identity in the forward pass and only affects gradients, so it is not
# part of this forward-only kernel.

if __name__ == "__main__":
    key = jax.random.PRNGKey(0)
    kx, kp = jax.random.split(key)

    # Small shapes consistent with the module (hidden=512 is fixed by fc1).
    # batch=100 exercises the batch-pad path; num_class=65 exercises the
    # class-pad (lane-dense) path.
    batch, inc, num_class, temp = 100, 256, 65, 0.05
    x = jax.random.normal(kx, (batch, inc), jnp.float32)
    w1_t, b1, w2_t = init_params(kp, inc, num_class)

    ref = reference_forward(x, w1_t, b1, w2_t, temp=temp)

    # Default single-tile path.
    out = predictor_deep_forward(x, w1_t, b1, w2_t, temp=temp)
    out = jax.block_until_ready(out)
    assert out.shape == (batch, num_class)
    assert jnp.allclose(out, ref, rtol=1e-3, atol=1e-3), "mismatch (tm=auto)"

    # Multi-step grid path (forced small tile) to exercise batch tiling.
    out2 = predictor_deep_forward(x, w1_t, b1, w2_t, temp=temp, tm=64)
    out2 = jax.block_until_ready(out2)
    assert jnp.allclose(out2, ref, rtol=1e-3, atol=1e-3), "mismatch (tm=64)"

    print("KERNEL_OK")
</pallas_src>

<mosaic_0001>
module attributes {stable_mosaic.version = 11 : i64} {
  func.func @_predictor_deep_kernel(%arg0: i32, %arg1: memref<104x256xf32, #tpu.memory_space<vmem>>, %arg2: memref<256x512xf32, #tpu.memory_space<vmem>>, %arg3: memref<1x512xf32, #tpu.memory_space<vmem>>, %arg4: memref<512x128xf32, #tpu.memory_space<vmem>>, %arg5: memref<104x128xf32, #tpu.memory_space<vmem>>) attributes {dimension_semantics = [#tpu.dimension_semantics<parallel>], iteration_bounds = array<i64: 1>, scalar_prefetch = 0 : i64, scratch_operands = 0 : i64, tpu.core_type = #tpu.core_type<tc>, window_params = [{transform_indices = @transform_0, window_bounds = array<i64: 104, 256>}, {pipeline_mode = #tpu.pipeline_mode<synchronous>, transform_indices = @transform_1, window_bounds = array<i64: 256, 512>}, {pipeline_mode = #tpu.pipeline_mode<synchronous>, transform_indices = @transform_2, window_bounds = array<i64: 1, 512>}, {pipeline_mode = #tpu.pipeline_mode<synchronous>, transform_indices = @transform_3, window_bounds = array<i64: 512, 128>}, {transform_indices = @transform_4, window_bounds = array<i64: 104, 128>}]} {
    %c0 = arith.constant 0 : index
    %c0_0 = arith.constant 0 : index
    %0 = vector.load %arg1[%c0, %c0_0] : memref<104x256xf32, #tpu.memory_space<vmem>>, vector<104x256xf32>
    %c0_1 = arith.constant 0 : index
    %c0_2 = arith.constant 0 : index
    %1 = vector.load %arg2[%c0_1, %c0_2] : memref<256x512xf32, #tpu.memory_space<vmem>>, vector<256x512xf32>
    %cst = arith.constant dense<0.000000e+00> : vector<104x512xf32>
    %2 = tpu.matmul %0, %1, %cst {dimension_numbers = #tpu.dot_dimension_numbers<[1], [0], [0], [1], [0, 0, 1, 1], [], []>} : vector<104x256xf32>, vector<256x512xf32>, vector<104x512xf32> -> vector<104x512xf32>
    %c0_3 = arith.constant 0 : index
    %c0_4 = arith.constant 0 : index
    %3 = vector.load %arg3[%c0_3, %c0_4] : memref<1x512xf32, #tpu.memory_space<vmem>>, vector<1x512xf32>
    %4 = vector.broadcast %3 : vector<1x512xf32> to vector<104x512xf32>
    %5 = arith.addf %2, %4 : vector<104x512xf32>
    %6 = arith.mulf %5, %5 : vector<104x512xf32>
    %cst_5 = arith.constant dense<0.000000e+00> : vector<104xf32>
    %7 = vector.multi_reduction <add>, %6, %cst_5 [1] : vector<104x512xf32> to vector<104xf32>
    %8 = vector.shape_cast %7 : vector<104xf32> to vector<104x1xf32>
    %cst_6 = arith.constant 1.000000e-24 : f32
    %9 = vector.broadcast %cst_6 : f32 to vector<104x1xf32>
    %10 = arith.maximumf %8, %9 : vector<104x1xf32>
    %11 = math.rsqrt %10 : vector<104x1xf32>
    %12 = vector.broadcast %11 : vector<104x1xf32> to vector<104x512xf32>
    %13 = arith.mulf %5, %12 : vector<104x512xf32>
    %c0_7 = arith.constant 0 : index
    %c0_8 = arith.constant 0 : index
    %14 = vector.load %arg4[%c0_7, %c0_8] : memref<512x128xf32, #tpu.memory_space<vmem>>, vector<512x128xf32>
    %cst_9 = arith.constant dense<0.000000e+00> : vector<104x128xf32>
    %15 = tpu.matmul %13, %14, %cst_9 {dimension_numbers = #tpu.dot_dimension_numbers<[1], [0], [0], [1], [0, 0, 1, 1], [], []>} : vector<104x512xf32>, vector<512x128xf32>, vector<104x128xf32> -> vector<104x128xf32>
    %cst_10 = arith.constant 2.000000e+01 : f32
    %16 = vector.broadcast %cst_10 : f32 to vector<104x128xf32>
    %17 = arith.mulf %15, %16 : vector<104x128xf32>
    %c0_11 = arith.constant 0 : index
    %c0_12 = arith.constant 0 : index
    %18 = vector.load %arg5[%c0_11, %c0_12] : memref<104x128xf32, #tpu.memory_space<vmem>>, vector<104x128xf32>
    tpu.vector_store %arg5[%c0_11, %c0_12], %17 {strides = array<i32>} : memref<104x128xf32, #tpu.memory_space<vmem>>, vector<104x128xf32>,
    return
  }
  func.func @transform_0(%arg0: i32) -> (i32, i32) {
    %c0_i32 = arith.constant 0 : i32
    %c0_i32_0 = arith.constant 0 : i32
    return %arg0, %c0_i32 : i32, i32
  }
  func.func @transform_1(%arg0: i32) -> (i32, i32) {
    %c0_i32 = arith.constant 0 : i32
    %c0_i32_0 = arith.constant 0 : i32
    %c0_i32_1 = arith.constant 0 : i32
    return %c0_i32, %c0_i32_0 : i32, i32
  }
  func.func @transform_2(%arg0: i32) -> (i32, i32) {
    %c0_i32 = arith.constant 0 : i32
    %c0_i32_0 = arith.constant 0 : i32
    %c0_i32_1 = arith.constant 0 : i32
    return %c0_i32, %c0_i32_0 : i32, i32
  }
  func.func @transform_3(%arg0: i32) -> (i32, i32) {
    %c0_i32 = arith.constant 0 : i32
    %c0_i32_0 = arith.constant 0 : i32
    %c0_i32_1 = arith.constant 0 : i32
    return %c0_i32, %c0_i32_0 : i32, i32
  }
  func.func @transform_4(%arg0: i32) -> (i32, i32) {
    %c0_i32 = arith.constant 0 : i32
    %c0_i32_0 = arith.constant 0 : i32
    return %arg0, %c0_i32 : i32, i32
  }
}

</mosaic_0001>

<bundles_post_ra>
// kernel: tpu_custom_call.1
= control target key start
LH: loop header
LB: loop body
LE: loop exit
PB: predicated region body
PF: predicated region fallthrough
CT: control target
= control target key end

     0   :  { %9 = vsyncpa [#allocation3], 0  ;;  %s1960_s0 = inlined_call_operand.hbm [shape: f32[104,256], index: 0, kind: input, shape index: {}]   ;;  %s1961_s1 = inlined_call_operand.hbm [shape: f32[256,512], index: 1, kind: input, shape index: {}]   ;;  %s1962_s2 = inlined_call_operand.vmem [shape: f32[1,512], index: 2, kind: input, shape index: {}]   ;;  %s1963_s3 = inlined_call_operand.hbm [shape: f32[512,128], index: 3, kind: input, shape index: {}]   ;;  %s1964_s4 = inlined_call_operand.hbm [shape: f32[104,128], index: 4, kind: output, shape index: {}]  }
   0x1   :  { %10 = vsyncpa [#allocation6], 0 }
   0x2   :  { %11 = vsyncpa [#allocation4], 0  ;;  %s1548_s15 = smov [#allocation5]   ;;  %s1454_s19 = scalar_lea.hbm %s1961_s1, 16384 }
   0x3   :  { %s29_s16 = sshll.u32 %s1548_s15, 4  ;;  %p1455_p0 = scmp.ne.s32.totalorder %s1961_s1, %s1454_s19  ;;  %s30_s16 = int_to_ptr.vmem [resolvable:$true] %s29_s16 }
   0x4   :  { %p1458_p1 = scmp.lt.u32.totalorder %s1454_s19, %s1961_s1 }
   0x6   :  { %p1460_p2 = pnand %p1458_p1, %p1455_p0 }
   0x8   :  { %1463 = shalt.err (!%p1460_p2)
}
   0x9   :  { %s1464_s24 = scalar_lea.vmem %s30_s16, 16384  ;;  %p1469_p4 = scmp.lt.s32.totalorder %s30_s16, %s30_s16 }
   0xa   :  { %p1465_p3 = scmp.ne.s32.totalorder %s30_s16, %s1464_s24  ;;  %p1470_p5 = scmp.lt.s32.totalorder %s1464_s24, %s1464_s24 }
   0xc   :  { %p1471_p6 = por %p1470_p5, %p1469_p4 }
   0xe   :  { %p1472_p7 = pnand %p1471_p6, %p1465_p3 }
  0x10   :  { %1475 = shalt.err (!%p1472_p7)
}
  0x11   :  { %s1549_s25 = smov 512   ;;  %s1550_s26 = smov 32  }
  0x12   :  { %35 = dma.hbm_to_vmem [thread:$0]  %s1961_s1, 16384, %s30_s16, [#allocation6], %s1549_s25, %s1549_s25, %s1550_s26  }
  0x13   :  { %s1551_s29 = smov [#allocation2]   ;;  %s1476_s7 = scalar_lea.hbm %s1960_s0, 3328 }
  0x14   :  { %s17_s30 = sshll.u32 %s1551_s29, 4  ;;  %p1477_p8 = scmp.ne.s32.totalorder %s1960_s0, %s1476_s7  ;;  %s18_s30 = int_to_ptr.vmem [resolvable:$true] %s17_s30 }
  0x15   :  { %p1480_p9 = scmp.lt.u32.totalorder %s1476_s7, %s1960_s0 }
  0x17   :  { %p1482_p10 = pnand %p1480_p9, %p1477_p8 }
  0x19   :  { %1485 = shalt.err (!%p1482_p10)
}
  0x1a   :  { %s1486_s12 = scalar_lea.vmem %s18_s30, 3328  ;;  %p1491_p12 = scmp.lt.s32.totalorder %s18_s30, %s18_s30 }
  0x1b   :  { %p1487_p11 = scmp.ne.s32.totalorder %s18_s30, %s1486_s12  ;;  %p1492_p13 = scmp.lt.s32.totalorder %s1486_s12, %s1486_s12 }
  0x1d   :  { %p1493_p0 = por %p1492_p13, %p1491_p12 }
  0x1f   :  { %p1494_p1 = pnand %p1493_p0, %p1487_p11 }
  0x21   :  { %1497 = shalt.err (!%p1494_p1)
}
  0x22   :  { %s1552_s1 = smov 256   ;;  %s1553_s13 = smov 16  }
  0x23   :  { %23 = dma.hbm_to_vmem [thread:$0]  %s1960_s0, 3328, %s18_s30, [#allocation3], %s1552_s1, %s1552_s1, %s1553_s13  }
  0x24   :  { %s1554_s16 = smov [#allocation7]   ;;  %s1498_s20 = scalar_lea.hbm %s1963_s3, 8192 }
  0x25   :  { %s43_s17 = sshll.u32 %s1554_s16, 4  ;;  %p1499_p2 = scmp.ne.s32.totalorder %s1963_s3, %s1498_s20  ;;  %s44_s17 = int_to_ptr.vmem [resolvable:$true] %s43_s17 }
  0x26   :  { %p1502_p3 = scmp.lt.u32.totalorder %s1498_s20, %s1963_s3 }
  0x28   :  { %p1504_p4 = pnand %p1502_p3, %p1499_p2 }
  0x2a   :  { %1507 = shalt.err (!%p1504_p4)
}
  0x2b   :  { %s1508_s25 = scalar_lea.vmem %s44_s17, 8192  ;;  %p1513_p6 = scmp.lt.s32.totalorder %s44_s17, %s44_s17 }
  0x2c   :  { %p1509_p5 = scmp.ne.s32.totalorder %s44_s17, %s1508_s25  ;;  %p1514_p7 = scmp.lt.s32.totalorder %s1508_s25, %s1508_s25 }
  0x2e   :  { %p1515_p8 = por %p1514_p7, %p1513_p6 }
  0x30   :  { %p1516_p9 = pnand %p1515_p8, %p1509_p5 }
  0x32   :  { %1519 = shalt.err (!%p1516_p9)
}
  0x33   :  { %s1555_s0 = smov 128   ;;  %s1556_s26 = smov 8  }
  0x34   :  { %49 = dma.hbm_to_vmem [thread:$0]  %s1963_s3, 8192, %s44_s17, [#allocation6], %s1555_s0, %s1555_s0, %s1556_s26  }
  0x35   :  { %1542 = dma.done.wait [#allocation3], 3328  }
  0x36   :  { %1543 = vsyncadd [#allocation3], 4294963968 }
  0x37   :  { %1544 = dma.done.wait [#allocation6], 24576  }
  0x38   :  { %1545 = vsyncadd [#allocation6], 4294942720  ;;  %v86_v0 = vld [vmem:[#allocation5 + $0x8] sm:$0xff]  ;;  %v85_v2 = vld [vmem:[#allocation5] sm:$0xff] }
  0x39   :  { %v90_v1 = vld [vmem:[#allocation5 + $0x28] sm:$0xff]  ;;  %v89_v4 = vld [vmem:[#allocation5 + $0x20] sm:$0xff]  ;;  %v88_v5 = vld [vmem:[#allocation5 + $0x18] sm:$0xff] }
  0x3a   :  { %v1226_v3 = vpack.c.bf16 %v90_v1, %v86_v0  ;;  %v92_v6 = vld [vmem:[#allocation5 + $0x38] sm:$0xff]  ;;  %v1228_v7 = vpack.c.bf16 %v89_v4, %v85_v2  ;;  %v87_v9 = vld [vmem:[#allocation5 + $0x10] sm:$0xff]  ;;  %v94_v11 = vld [vmem:[#allocation5 + $0x48] sm:$0xff] }
  0x3b   :  { %v1290_v8 = vpack.c.bf16 %v92_v6, %v88_v5  ;;  %v91_v10 = vld [vmem:[#allocation5 + $0x30] sm:$0xff]  ;;  %v98_v13 = vld [vmem:[#allocation5 + $0x68] sm:$0xff]  ;;  %v93_v14 = vld [vmem:[#allocation5 + $0x40] sm:$0xff] }
  0x3c   :  { %1227 = vmatprep.subr.bf16.mxu0 %v1226_v3  ;;  %v1292_v12 = vpack.c.bf16 %v91_v10, %v87_v9  ;;  %v97_v15 = vld [vmem:[#allocation5 + $0x60] sm:$0xff]  ;;  %v1230_v16 = vpack.c.bf16 %v98_v13, %v94_v11  ;;  %v96_v18 = vld [vmem:[#allocation5 + $0x58] sm:$0xff]  ;;  %v95_v20 = vld [vmem:[#allocation5 + $0x50] sm:$0xff] }
  0x3d   :  { %1229 = vmatpush1.bf16.msra.mxu0 %v1228_v7  ;;  %1291 = vmatprep.subr.bf16.mxu1 %v1290_v8  ;;  %v1232_v17 = vpack.c.bf16 %v97_v15, %v93_v14  ;;  %v100_v19 = vld [vmem:[#allocation5 + $0x78] sm:$0xff]  ;;  %v99_v22 = vld [vmem:[#allocation5 + $0x70] sm:$0xff]  ;;  %v102_v23 = vld [vmem:[#allocation5 + $0x88] sm:$0xff] }
  0x3e   :  { %1293 = vmatpush1.bf16.msra.mxu1 %v1292_v12  ;;  %v1294_v21 = vpack.c.bf16 %v100_v19, %v96_v18  ;;  %v106_v24 = vld [vmem:[#allocation5 + $0xa8] sm:$0xff]  ;;  %1231 = vmatprep.subr.bf16.mxu0 %v1230_v16  ;;  %v1296_v25 = vpack.c.bf16 %v99_v22, %v95_v20  ;;  %v101_v27 = vld [vmem:[#allocation5 + $0x80] sm:$0xff]  ;;  %v104_v29 = vld [vmem:[#allocation5 + $0x98] sm:$0xff] }
  0x3f   :  { %v1234_v26 = vpack.c.bf16 %v106_v24, %v102_v23  ;;  %v105_v28 = vld [vmem:[#allocation5 + $0xa0] sm:$0xff]  ;;  %v108_v30 = vld [vmem:[#allocation5 + $0xb8] sm:$0xff]  ;;  %v103_v31 = vld [vmem:[#allocation5 + $0x90] sm:$0xff] }
  0x40   :  { %1295 = vmatprep.subr.bf16.mxu1 %v1294_v21  ;;  %v107_v32 = vld [vmem:[#allocation5 + $0xb0] sm:$0xff]  ;;  %v1236_v33 = vpack.c.bf16 %v105_v28, %v101_v27  ;;  %v1298_v34 = vpack.c.bf16 %v108_v30, %v104_v29  ;;  %v110_v35 = vld [vmem:[#allocation5 + $0xc8] sm:$0xff]  ;;  %v109_v37 = vld [vmem:[#allocation5 + $0xc0] sm:$0xff] }
  0x41   :  { %1233 = vmatpush1.bf16.msra.mxu0 %v1232_v17  ;;  %v114_v36 = vld [vmem:[#allocation5 + $0xe8] sm:$0xff]  ;;  %v1300_v38 = vpack.c.bf16 %v107_v32, %v103_v31  ;;  %v113_v40 = vld [vmem:[#allocation5 + $0xe0] sm:$0xff]  ;;  %v112_v41 = vld [vmem:[#allocation5 + $0xd8] sm:$0xff] }
  0x42   :  { %1297 = vmatpush1.bf16.msra.mxu1 %v1296_v25  ;;  %1235 = vmatprep.subr.bf16.mxu0 %v1234_v26  ;;  %v1238_v39 = vpack.c.bf16 %v114_v36, %v110_v35  ;;  %v116_v42 = vld [vmem:[#allocation5 + $0xf8] sm:$0xff]  ;;  %v111_v44 = vld [vmem:[#allocation5 + $0xd0] sm:$0xff]  ;;  %v118_v46 = vld [vmem:[#allocation5 + $0x108] sm:$0xff]  ;;  %v1240_v48 = vpack.c.bf16 %v113_v40, %v109_v37 }
  0x43   :  { %1299 = vmatprep.subr.bf16.mxu1 %v1298_v34  ;;  %v1302_v43 = vpack.c.bf16 %v116_v42, %v112_v41  ;;  %v115_v45 = vld [vmem:[#allocation5 + $0xf0] sm:$0xff]  ;;  %v122_v47 = vld [vmem:[#allocation5 + $0x128] sm:$0xff]  ;;  %v120_v49 = vld [vmem:[#allocation5 + $0x118] sm:$0xff] }
  0x44   :  { %v124_v50 = vld [vmem:[#allocation5 + $0x138] sm:$0xff]  ;;  %v1304_v51 = vpack.c.bf16 %v115_v45, %v111_v44  ;;  %v1242_v52 = vpack.c.bf16 %v122_v47, %v118_v46  ;;  %v117_v53 = vld [vmem:[#allocation5 + $0x100] sm:$0xff]  ;;  %v119_v55 = vld [vmem:[#allocation5 + $0x110] sm:$0xff] }
  0x45   :  { %1237 = vmatpush1.bf16.msra.mxu0 %v1236_v33  ;;  %v121_v54 = vld [vmem:[#allocation5 + $0x120] sm:$0xff]  ;;  %v1306_v56 = vpack.c.bf16 %v124_v50, %v120_v49  ;;  %v123_v57 = vld [vmem:[#allocation5 + $0x130] sm:$0xff]  ;;  %v126_v58 = vld [vmem:[#allocation5 + $0x148] sm:$0xff] }
  0x46   :  { %1301 = vmatpush1.bf16.msra.mxu1 %v1300_v38  ;;  %1239 = vmatprep.subr.bf16.mxu0 %v1238_v39  ;;  %v130_v59 = vld [vmem:[#allocation5 + $0x168] sm:$0xff]  ;;  %v128_v60 = vld [vmem:[#allocation5 + $0x158] sm:$0xff]  ;;  %v1244_v62 = vpack.c.bf16 %v121_v54, %v117_v53  ;;  %v1308_v63 = vpack.c.bf16 %v123_v57, %v119_v55  ;;  %v125_v1 = vld [vmem:[#allocation5 + $0x140] sm:$0xff] }
  0x47   :  { %1303 = vmatprep.subr.bf16.mxu1 %v1302_v43  ;;  %v132_v61 = vld [vmem:[#allocation5 + $0x178] sm:$0xff]  ;;  %v1246_v0 = vpack.c.bf16 %v130_v59, %v126_v58  ;;  %v129_v2 = vld [vmem:[#allocation5 + $0x160] sm:$0xff]  ;;  %v127_v3 = vld [vmem:[#allocation5 + $0x150] sm:$0xff] }
  0x48   :  { %v1310_v4 = vpack.c.bf16 %v132_v61, %v128_v60  ;;  %v131_v5 = vld [vmem:[#allocation5 + $0x170] sm:$0xff]  ;;  %v134_v6 = vld [vmem:[#allocation5 + $0x188] sm:$0xff]  ;;  %v136_v8 = vld [vmem:[#allocation5 + $0x198] sm:$0xff]  ;;  %v1248_v10 = vpack.c.bf16 %v129_v2, %v125_v1 }
  0x49   :  { %1241 = vmatpush1.bf16.msra.mxu0 %v1240_v48  ;;  %v138_v7 = vld [vmem:[#allocation5 + $0x1a8] sm:$0xff]  ;;  %v140_v9 = vld [vmem:[#allocation5 + $0x1b8] sm:$0xff]  ;;  %v1312_v11 = vpack.c.bf16 %v131_v5, %v127_v3  ;;  %v133_v13 = vld [vmem:[#allocation5 + $0x180] sm:$0xff] }
  0x4a   :  { %1305 = vmatpush1.bf16.msra.mxu1 %v1304_v51  ;;  %1243 = vmatprep.subr.bf16.mxu0 %v1242_v52  ;;  %v1250_v12 = vpack.c.bf16 %v138_v7, %v134_v6  ;;  %v137_v14 = vld [vmem:[#allocation5 + $0x1a0] sm:$0xff]  ;;  %v135_v15 = vld [vmem:[#allocation5 + $0x190] sm:$0xff]  ;;  %v1314_v16 = vpack.c.bf16 %v140_v9, %v136_v8  ;;  %v142_v18 = vld [vmem:[#allocation5 + $0x1c8] sm:$0xff] }
  0x4b   :  { %1307 = vmatprep.subr.bf16.mxu1 %v1306_v56  ;;  %v139_v17 = vld [vmem:[#allocation5 + $0x1b0] sm:$0xff]  ;;  %v146_v19 = vld [vmem:[#allocation5 + $0x1e8] sm:$0xff]  ;;  %v144_v20 = vld [vmem:[#allocation5 + $0x1d8] sm:$0xff]  ;;  %v1252_v22 = vpack.c.bf16 %v137_v14, %v133_v13 }
  0x4c   :  { %v148_v21 = vld [vmem:[#allocation5 + $0x1f8] sm:$0xff]  ;;  %v1316_v23 = vpack.c.bf16 %v139_v17, %v135_v15  ;;  %v1254_v24 = vpack.c.bf16 %v146_v19, %v142_v18  ;;  %v141_v25 = vld [vmem:[#allocation5 + $0x1c0] sm:$0xff]  ;;  %v143_v27 = vld [vmem:[#allocation5 + $0x1d0] sm:$0xff] }
  0x4d   :  { %1245 = vmatpush1.bf16.msra.mxu0 %v1244_v62  ;;  %v145_v26 = vld [vmem:[#allocation5 + $0x1e0] sm:$0xff]  ;;  %v1318_v28 = vpack.c.bf16 %v148_v21, %v144_v20  ;;  %v147_v29 = vld [vmem:[#allocation5 + $0x1f0] sm:$0xff]  ;;  %v150_v30 = vld [vmem:[#allocation5 + $0x208] sm:$0xff] }
  0x4e   :  { %1309 = vmatpush1.bf16.msra.mxu1 %v1308_v63  ;;  %1247 = vmatprep.subr.bf16.mxu0 %v1246_v0  ;;  %v154_v31 = vld [vmem:[#allocation5 + $0x228] sm:$0xff]  ;;  %v152_v32 = vld [vmem:[#allocation5 + $0x218] sm:$0xff]  ;;  %v1256_v34 = vpack.c.bf16 %v145_v26, %v141_v25  ;;  %v1320_v35 = vpack.c.bf16 %v147_v29, %v143_v27  ;;  %v149_v37 = vld [vmem:[#allocation5 + $0x200] sm:$0xff] }
  0x4f   :  { %1311 = vmatprep.subr.bf16.mxu1 %v1310_v4  ;;  %v156_v33 = vld [vmem:[#allocation5 + $0x238] sm:$0xff]  ;;  %v1258_v36 = vpack.c.bf16 %v154_v31, %v150_v30  ;;  %v153_v38 = vld [vmem:[#allocation5 + $0x220] sm:$0xff]  ;;  %v151_v39 = vld [vmem:[#allocation5 + $0x210] sm:$0xff] }
  0x50   :  { %v1322_v40 = vpack.c.bf16 %v156_v33, %v152_v32  ;;  %v155_v41 = vld [vmem:[#allocation5 + $0x230] sm:$0xff]  ;;  %v158_v42 = vld [vmem:[#allocation5 + $0x248] sm:$0xff]  ;;  %v160_v44 = vld [vmem:[#allocation5 + $0x258] sm:$0xff]  ;;  %v1260_v46 = vpack.c.bf16 %v153_v38, %v149_v37 }
  0x51   :  { %1249 = vmatpush1.bf16.msra.mxu0 %v1248_v10  ;;  %v162_v43 = vld [vmem:[#allocation5 + $0x268] sm:$0xff]  ;;  %v164_v45 = vld [vmem:[#allocation5 + $0x278] sm:$0xff]  ;;  %v1324_v47 = vpack.c.bf16 %v155_v41, %v151_v39  ;;  %v157_v49 = vld [vmem:[#allocation5 + $0x240] sm:$0xff] }
  0x52   :  { %1313 = vmatpush1.bf16.msra.mxu1 %v1312_v11  ;;  %1251 = vmatprep.subr.bf16.mxu0 %v1250_v12  ;;  %v1262_v48 = vpack.c.bf16 %v162_v43, %v158_v42  ;;  %v161_v50 = vld [vmem:[#allocation5 + $0x260] sm:$0xff]  ;;  %v159_v51 = vld [vmem:[#allocation5 + $0x250] sm:$0xff]  ;;  %v1326_v52 = vpack.c.bf16 %v164_v45, %v160_v44  ;;  %v166_v54 = vld [vmem:[#allocation5 + $0x288] sm:$0xff] }
  0x53   :  { %1315 = vmatprep.subr.bf16.mxu1 %v1314_v16  ;;  %v163_v53 = vld [vmem:[#allocation5 + $0x270] sm:$0xff]  ;;  %v170_v55 = vld [vmem:[#allocation5 + $0x2a8] sm:$0xff]  ;;  %v168_v56 = vld [vmem:[#allocation5 + $0x298] sm:$0xff]  ;;  %v1264_v58 = vpack.c.bf16 %v161_v50, %v157_v49 }
  0x54   :  { %v172_v57 = vld [vmem:[#allocation5 + $0x2b8] sm:$0xff]  ;;  %v1328_v59 = vpack.c.bf16 %v163_v53, %v159_v51  ;;  %v1266_v60 = vpack.c.bf16 %v170_v55, %v166_v54  ;;  %v165_v61 = vld [vmem:[#allocation5 + $0x280] sm:$0xff]  ;;  %v167_v63 = vld [vmem:[#allocation5 + $0x290] sm:$0xff] }
  0x55   :  { %1253 = vmatpush1.bf16.msra.mxu0 %v1252_v22  ;;  %v169_v62 = vld [vmem:[#allocation5 + $0x2a0] sm:$0xff]  ;;  %v1330_v0 = vpack.c.bf16 %v172_v57, %v168_v56  ;;  %v171_v1 = vld [vmem:[#allocation5 + $0x2b0] sm:$0xff]  ;;  %v174_v2 = vld [vmem:[#allocation5 + $0x2c8] sm:$0xff] }
  0x56   :  { %1317 = vmatpush1.bf16.msra.mxu1 %v1316_v23  ;;  %1255 = vmatprep.subr.bf16.mxu0 %v1254_v24  ;;  %v178_v3 = vld [vmem:[#allocation5 + $0x2e8] sm:$0xff]  ;;  %v176_v4 = vld [vmem:[#allocation5 + $0x2d8] sm:$0xff]  ;;  %v1268_v6 = vpack.c.bf16 %v169_v62, %v165_v61  ;;  %v173_v7 = vld [vmem:[#allocation5 + $0x2c0] sm:$0xff]  ;;  %v1332_v8 = vpack.c.bf16 %v171_v1, %v167_v63 }
  0x57   :  { %1319 = vmatprep.subr.bf16.mxu1 %v1318_v28  ;;  %v180_v5 = vld [vmem:[#allocation5 + $0x2f8] sm:$0xff]  ;;  %v1270_v9 = vpack.c.bf16 %v178_v3, %v174_v2  ;;  %v177_v10 = vld [vmem:[#allocation5 + $0x2e0] sm:$0xff]  ;;  %v175_v11 = vld [vmem:[#allocation5 + $0x2d0] sm:$0xff] }
  0x58   :  { %v179_v12 = vld [vmem:[#allocation5 + $0x2f0] sm:$0xff]  ;;  %v1334_v13 = vpack.c.bf16 %v180_v5, %v176_v4  ;;  %v182_v14 = vld [vmem:[#allocation5 + $0x308] sm:$0xff]  ;;  %v60_v16 = vld [vmem:[#allocation2 + $0x8] sm:$0xff]  ;;  %v1272_v19 = vpack.c.bf16 %v177_v10, %v173_v7 }
  0x59   :  { %1257 = vmatpush1.bf16.msra.mxu0 %v1256_v34  ;;  %v186_v15 = vld [vmem:[#allocation5 + $0x328] sm:$0xff]  ;;  %v184_v17 = vld [vmem:[#allocation5 + $0x318] sm:$0xff]  ;;  %299 = vmatprep.mubr.f32.mxu0 %v60_v16  ;;  %v1336_v20 = vpack.c.bf16 %v179_v12, %v175_v11  ;;  %v181_v22 = vld [vmem:[#allocation5 + $0x300] sm:$0xff] }
  0x5a   :  { %1321 = vmatpush1.bf16.msra.mxu1 %v1320_v35  ;;  %1259 = vmatprep.subr.bf16.mxu0 %v1258_v36  ;;  %v188_v18 = vld [vmem:[#allocation5 + $0x338] sm:$0xff]  ;;  %v1274_v21 = vpack.c.bf16 %v186_v15, %v182_v14  ;;  %v185_v23 = vld [vmem:[#allocation5 + $0x320] sm:$0xff]  ;;  %v183_v24 = vld [vmem:[#allocation5 + $0x310] sm:$0xff] }
  0x5b   :  { %1323 = vmatprep.subr.bf16.mxu1 %v1322_v40  ;;  %442 = vmatprep.mubr.f32.mxu1 %v60_v16  ;;  %v1338_v25 = vpack.c.bf16 %v188_v18, %v184_v17  ;;  %v187_v26 = vld [vmem:[#allocation5 + $0x330] sm:$0xff]  ;;  %v190_v27 = vld [vmem:[#allocation5 + $0x348] sm:$0xff]  ;;  %v192_v29 = vld [vmem:[#allocation5 + $0x358] sm:$0xff]  ;;  %v1276_v31 = vpack.c.bf16 %v185_v23, %v181_v22 }
  0x5c   :  { %v194_v28 = vld [vmem:[#allocation5 + $0x368] sm:$0xff]  ;;  %v196_v30 = vld [vmem:[#allocation5 + $0x378] sm:$0xff]  ;;  %v1340_v32 = vpack.c.bf16 %v187_v26, %v183_v24  ;;  %v189_v34 = vld [vmem:[#allocation5 + $0x340] sm:$0xff] }
  0x5d   :  { %1261 = vmatpush1.bf16.msra.mxu0 %v1260_v46  ;;  %v1278_v33 = vpack.c.bf16 %v194_v28, %v190_v27  ;;  %v193_v35 = vld [vmem:[#allocation5 + $0x360] sm:$0xff]  ;;  %v191_v36 = vld [vmem:[#allocation5 + $0x350] sm:$0xff]  ;;  %v1342_v37 = vpack.c.bf16 %v196_v30, %v192_v29  ;;  %v198_v39 = vld [vmem:[#allocation5 + $0x388] sm:$0xff] }
  0x5e   :  { %1325 = vmatpush1.bf16.msra.mxu1 %v1324_v47  ;;  %1263 = vmatprep.subr.bf16.mxu0 %v1262_v48  ;;  %v195_v38 = vld [vmem:[#allocation5 + $0x370] sm:$0xff]  ;;  %v202_v40 = vld [vmem:[#allocation5 + $0x3a8] sm:$0xff]  ;;  %v200_v41 = vld [vmem:[#allocation5 + $0x398] sm:$0xff]  ;;  %v1280_v43 = vpack.c.bf16 %v193_v35, %v189_v34 }
  0x5f   :  { %1327 = vmatprep.subr.bf16.mxu1 %v1326_v52  ;;  %v204_v42 = vld [vmem:[#allocation5 + $0x3b8] sm:$0xff]  ;;  %v1344_v44 = vpack.c.bf16 %v195_v38, %v191_v36  ;;  %v1282_v45 = vpack.c.bf16 %v202_v40, %v198_v39  ;;  %v197_v46 = vld [vmem:[#allocation5 + $0x380] sm:$0xff]  ;;  %v199_v48 = vld [vmem:[#allocation5 + $0x390] sm:$0xff] }
  0x60   :  { %v201_v47 = vld [vmem:[#allocation5 + $0x3a0] sm:$0xff]  ;;  %v1346_v49 = vpack.c.bf16 %v204_v42, %v200_v41  ;;  %v203_v50 = vld [vmem:[#allocation5 + $0x3b0] sm:$0xff]  ;;  %v206_v51 = vld [vmem:[#allocation5 + $0x3c8] sm:$0xff] }
  0x61   :  { %1265 = vmatpush1.bf16.msra.mxu0 %v1264_v58  ;;  %v210_v52 = vld [vmem:[#allocation5 + $0x3e8] sm:$0xff]  ;;  %v208_v53 = vld [vmem:[#allocation5 + $0x3d8] sm:$0xff]  ;;  %v1284_v55 = vpack.c.bf16 %v201_v47, %v197_v46  ;;  %v1348_v56 = vpack.c.bf16 %v203_v50, %v199_v48  ;;  %v205_v58 = vld [vmem:[#allocation5 + $0x3c0] sm:$0xff] }
  0x62   :  { %1329 = vmatpush1.bf16.msra.mxu1 %v1328_v59  ;;  %1267 = vmatprep.subr.bf16.mxu0 %v1266_v60  ;;  %v212_v54 = vld [vmem:[#allocation5 + $0x3f8] sm:$0xff]  ;;  %v1286_v57 = vpack.c.bf16 %v210_v52, %v206_v51  ;;  %v209_v59 = vld [vmem:[#allocation5 + $0x3e0] sm:$0xff]  ;;  %v207_v61 = vld [vmem:[#allocation5 + $0x3d0] sm:$0xff] }
  0x63   :  { %1331 = vmatprep.subr.bf16.mxu1 %v1330_v0  ;;  %v1350_v60 = vpack.c.bf16 %v212_v54, %v208_v53  ;;  %v211_v62 = vld [vmem:[#allocation5 + $0x3f0] sm:$0xff]  ;;  %v1288_v63 = vpack.c.bf16 %v209_v59, %v205_v58  ;;  %v62_v2 = vld [vmem:[#allocation2 + $0x18] sm:$0xff]  ;;  %v61_v3 = vld [vmem:[#allocation2 + $0x10] sm:$0xff] }
  0x64   :  { %v1352_v0 = vpack.c.bf16 %v211_v62, %v207_v61  ;;  %v59_v1 = vld [vmem:[#allocation2] sm:$0xff]  ;;  %v64_v4 = vld [vmem:[#allocation2 + $0x28] sm:$0xff]  ;;  %v65_v7 = vld [vmem:[#allocation2 + $0x30] sm:$0xff] }
  0x65   :  { %1269 = vmatpush1.bf16.msra.mxu0 %v1268_v6  ;;  %v63_v5 = vld [vmem:[#allocation2 + $0x20] sm:$0xff]  ;;  %v66_v6 = vld [vmem:[#allocation2 + $0x38] sm:$0xff]  ;;  %v69_v11 = vld [vmem:[#allocation2 + $0x50] sm:$0xff] }
  0x66   :  { %1333 = vmatpush1.bf16.msra.mxu1 %v1332_v8  ;;  %1271 = vmatprep.subr.bf16.mxu0 %v1270_v9  ;;  %v68_v8 = vld [vmem:[#allocation2 + $0x48] sm:$0xff]  ;;  %v67_v9 = vld [vmem:[#allocation2 + $0x40] sm:$0xff]  ;;  %v70_v10 = vld [vmem:[#allocation2 + $0x58] sm:$0xff] }
  0x67   :  { %1335 = vmatprep.subr.bf16.mxu1 %v1334_v13  ;;  %v72_v12 = vld [vmem:[#allocation2 + $0x68] sm:$0xff]  ;;  %v71_v13 = vld [vmem:[#allocation2 + $0x60] sm:$0xff]  ;;  %v74_v14 = vld [vmem:[#allocation2 + $0x78] sm:$0xff] }
  0x68   :  { %v73_v15 = vld [vmem:[#allocation2 + $0x70] sm:$0xff]  ;;  %v76_v16 = vld [vmem:[#allocation2 + $0x88] sm:$0xff]  ;;  %v75_v17 = vld [vmem:[#allocation2 + $0x80] sm:$0xff] }
  0x69   :  { %1273 = vmatpush1.bf16.msra.mxu0 %v1272_v19  ;;  %v78_v18 = vld [vmem:[#allocation2 + $0x98] sm:$0xff]  ;;  %v77_v19 = vld [vmem:[#allocation2 + $0x90] sm:$0xff]  ;;  %v84_v24 = vld [vmem:[#allocation2 + $0xc8] sm:$0xff] }
  0x6a   :  { %1337 = vmatpush1.bf16.msra.mxu1 %v1336_v20  ;;  %1275 = vmatprep.subr.bf16.mxu0 %v1274_v21  ;;  %v80_v20 = vld [vmem:[#allocation2 + $0xa8] sm:$0xff]  ;;  %v79_v21 = vld [vmem:[#allocation2 + $0xa0] sm:$0xff]  ;;  %v82_v22 = vld [vmem:[#allocation2 + $0xb8] sm:$0xff] }
  0x6b   :  { %1339 = vmatprep.subr.bf16.mxu1 %v1338_v25  ;;  %v81_v23 = vld [vmem:[#allocation2 + $0xb0] sm:$0xff]  ;;  %v83_v25 = vld [vmem:[#allocation2 + $0xc0] sm:$0xff]  ;;  %v733_v27 = vld [vmem:[#allocation7 + $0x88] sm:$0xff] }
  0x6c   :  { %v732_v26 = vld [vmem:[#allocation7 + $0x80] sm:$0xff]  ;;  %v765_v30 = vld [vmem:[#allocation7 + $0x188] sm:$0xff]  ;;  %v735_v39 = vld [vmem:[#allocation7 + $0x98] sm:$0xff] }
  0x6d   :  { %1277 = vmatpush1.bf16.msra.mxu0 %v1276_v31  ;;  %v764_v28 = vld [vmem:[#allocation7 + $0x180] sm:$0xff]  ;;  %v1354_v29 = vpack.c.bf16 %v733_v27, %v732_v26  ;;  %v749_v36 = vld [vmem:[#allocation7 + $0x108] sm:$0xff]  ;;  %v766_v40 = vld [vmem:[#allocation7 + $0x190] sm:$0xff] }
  0x6e   :  { %1341 = vmatpush1.bf16.msra.mxu1 %v1340_v32  ;;  %1279 = vmatprep.subr.bf16.mxu0 %v1278_v33  ;;  %v716_v31 = vld [vmem:[#allocation7] sm:$0xff]  ;;  %v717_v32 = vld [vmem:[#allocation7 + $0x8] sm:$0xff]  ;;  %v1386_v33 = vpack.c.bf16 %v765_v30, %v764_v28  ;;  %v767_v41 = vld [vmem:[#allocation7 + $0x198] sm:$0xff] }
  0x6f   :  { %1343 = vmatprep.subr.bf16.mxu1 %v1342_v37  ;;  %v1356_v34 = vpack.c.bf16 %v717_v32, %v716_v31  ;;  %v748_v35 = vld [vmem:[#allocation7 + $0x100] sm:$0xff]  ;;  %v734_v37 = vld [vmem:[#allocation7 + $0x90] sm:$0xff]  ;;  %v751_v48 = vld [vmem:[#allocation7 + $0x118] sm:$0xff] }
  0x70   :  { %v1388_v38 = vpack.c.bf16 %v749_v36, %v748_v35  ;;  %v1358_v42 = vpack.c.bf16 %v735_v39, %v734_v37  ;;  %v750_v46 = vld [vmem:[#allocation7 + $0x110] sm:$0xff]  ;;  %v737_v50 = vld [vmem:[#allocation7 + $0xa8] sm:$0xff]  ;;  %v768_v53 = vld [vmem:[#allocation7 + $0x1a0] sm:$0xff] }
  0x71   :  { %1281 = vmatpush1.bf16.msra.mxu0 %v1280_v43  ;;  %v1390_v43 = vpack.c.bf16 %v767_v41, %v766_v40  ;;  %v1392_v51 = vpack.c.bf16 %v751_v48, %v750_v46  ;;  %v769_v54 = vld [vmem:[#allocation7 + $0x1a8] sm:$0xff]  ;;  %v752_v58 = vld [vmem:[#allocation7 + $0x120] sm:$0xff]  ;;  %v738_v61 = vld [vmem:[#allocation7 + $0xb0] sm:$0xff] }
  0x72   :  { %1345 = vmatpush1.bf16.msra.mxu1 %v1344_v44  ;;  %1283 = vmatprep.subr.bf16.mxu0 %v1282_v45  ;;  %v718_v44 = vld [vmem:[#allocation7 + $0x10] sm:$0xff]  ;;  %v719_v45 = vld [vmem:[#allocation7 + $0x18] sm:$0xff]  ;;  %v753_v59 = vld [vmem:[#allocation7 + $0x128] sm:$0xff] }
  0x73   :  { %1347 = vmatprep.subr.bf16.mxu1 %v1346_v49  ;;  %v1360_v47 = vpack.c.bf16 %v719_v45, %v718_v44  ;;  %v736_v49 = vld [vmem:[#allocation7 + $0xa0] sm:$0xff]  ;;  %v739_v62 = vld [vmem:[#allocation7 + $0xb8] sm:$0xff]  ;;  %v726_v27 = vld [vmem:[#allocation7 + $0x50] sm:$0xff] }
  0x74   :  { %v1362_v52 = vpack.c.bf16 %v737_v50, %v736_v49  ;;  %v727_v28 = vld [vmem:[#allocation7 + $0x58] sm:$0xff]  ;;  %v758_v30 = vld [vmem:[#allocation7 + $0x150] sm:$0xff] }
  0x75   :  { %1285 = vmatpush1.bf16.msra.mxu0 %v1284_v55  ;;  %v720_v55 = vld [vmem:[#allocation7 + $0x20] sm:$0xff]  ;;  %v759_v31 = vld [vmem:[#allocation7 + $0x158] sm:$0xff]  ;;  %v1376_v32 = vpack.c.bf16 %v727_v28, %v726_v27  ;;  %v213_v37 = vld [vmem:[%s1962_s2] sm:$0xf]  ;;  %s1557_s2 = smov [#allocation8]  }
  0x76   :  { %1349 = vmatpush1.bf16.msra.mxu1 %v1348_v56  ;;  %1287 = vmatprep.subr.bf16.mxu0 %v1286_v57  ;;  %v1394_v56 = vpack.c.bf16 %v769_v54, %v768_v53  ;;  %v721_v57 = vld [vmem:[#allocation7 + $0x28] sm:$0xff]  ;;  %s1071_s30 = sshll.u32 %s1557_s2, 4  ;;  %s1072_s30 = int_to_ptr.vmem [resolvable:$true] %s1071_s30 }
  0x77   :  { %1351 = vmatprep.subr.bf16.mxu1 %v1350_v60  ;;  %v1364_v60 = vpack.c.bf16 %v721_v57, %v720_v55  ;;  %s1520_s5 = scalar_lea.vmem %s1072_s30, 1664  ;;  %p1525_p11 = scmp.lt.s32.totalorder %s1072_s30, %s1072_s30 }
  0x78   :  { %p1521_p10 = scmp.ne.s32.totalorder %s1072_s30, %s1520_s5  ;;  %p1526_p12 = scmp.lt.s32.totalorder %s1520_s5, %s1520_s5 }
  0x79   :  { %1289 = vmatpush1.bf16.msra.mxu0 %v1288_v63  ;;  %v770_v63 = vld [vmem:[#allocation7 + $0x1b0] sm:$0xff] }
  0x7a   :  { %1353 = vmatpush1.bf16.msra.mxu1 %v1352_v0  ;;  %1355 = vmatprep.subr.bf16.mxu0 %v1354_v29  ;;  %v1396_v0 = vpack.c.bf16 %v753_v59, %v752_v58  ;;  %p1527_p13 = por %p1526_p12, %p1525_p11 }
  0x7b   :  { %1387 = vmatprep.subr.bf16.mxu1 %v1386_v33  ;;  %v1408_v33 = vpack.c.bf16 %v759_v31, %v758_v30 }
  0x7c   :  { %300 = vmatmul.mubr.f32.vlgmr.msra.gmra.mrb[0].mxu0 %v59_v1  ;;  %p1528_p0 = pnand %p1527_p13, %p1521_p10 }
  0x7d   :  { %443 = vmatmul.mubr.f32.vlgmr.msra.gmra.mrb[0].mxu1 %v59_v1  ;;  %305 = vmatprep.mubr.f32.mxu0 %v62_v2  ;;  %v1366_v1 = vpack.c.bf16 %v739_v62, %v738_v61 }
  0x7e   :  { %448 = vmatprep.mubr.f32.mxu1 %v62_v2  ;;  %1357 = vmatpush3.bf16.msra.mxu0 %v1356_v34  ;;  %v771_v2 = vld [vmem:[#allocation7 + $0x1b8] sm:$0xff]  ;;  %v215_v34 = vlaneseq }
  0x7f   :  { %1389 = vmatpush3.bf16.msra.mxu1 %v1388_v38  ;;  %1359 = vmatprep.subr.bf16.mxu0 %v1358_v42 }
  0x80   :  { %306 = vmatmul.mubr.f32.gmra.mrb[2].mxu0 %v61_v3  ;;  %1391 = vmatprep.subr.bf16.mxu1 %v1390_v43  ;;  %v216_v35 = vshrl.u32 %v215_v34, 7 }
  0x81   :  { %449 = vmatmul.mubr.f32.gmra.mrb[2].mxu1 %v61_v3  ;;  %311 = vmatprep.mubr.f32.mxu0 %v64_v4  ;;  %v722_v3 = vld [vmem:[#allocation7 + $0x30] sm:$0xff] }
  0x82   :  { %454 = vmatprep.mubr.f32.mxu1 %v64_v4  ;;  %1361 = vmatpush3.bf16.msra.mxu0 %v1360_v47  ;;  %v723_v4 = vld [vmem:[#allocation7 + $0x38] sm:$0xff]  ;;  %v217_v36 = vsub.s32 0, %v216_v35  ;;  %v221_v38 = vsub.s32 1, %v216_v35  ;;  %v225_v39 = vsub.s32 2, %v216_v35  ;;  %v229_v40 = vsub.s32 3, %v216_v35 }
  0x83   :  { %1393 = vmatpush3.bf16.msra.mxu1 %v1392_v51  ;;  %1363 = vmatprep.subr.bf16.mxu0 %v1362_v52 }
  0x84   :  { %312 = vmatmul.mubr.f32.gmra.mrb[4].mxu0 %v63_v5  ;;  %1395 = vmatprep.subr.bf16.mxu1 %v1394_v56  ;;  %v1625_v41 = vrot.slane %v213_v37, %v217_v36  ;;  %v1627_v42 = vrot.slane %v213_v37, %v221_v38  ;;  %v1629_v43 = vrot.slane %v213_v37, %v225_v39 }
  0x85   :  { %455 = vmatmul.mubr.f32.gmra.mrb[4].mxu1 %v63_v5  ;;  %317 = vmatprep.mubr.f32.mxu0 %v66_v6  ;;  %v1398_v5 = vpack.c.bf16 %v771_v2, %v770_v63  ;;  %v1631_v44 = vrot.slane %v213_v37, %v229_v40 }
  0x86   :  { %460 = vmatprep.mubr.f32.mxu1 %v66_v6  ;;  %v754_v6 = vld [vmem:[#allocation7 + $0x130] sm:$0xff]  ;;  %1365 = vmatpush3.bf16.msra.mxu0 %v1364_v60 }
  0x87   :  { %1397 = vmatpush3.bf16.msra.mxu1 %v1396_v0  ;;  %1367 = vmatprep.subr.bf16.mxu0 %v1366_v1 }
  0x88   :  { %318 = vmatmul.mubr.f32.gmra.mrb[6].mxu0 %v65_v7  ;;  %1399 = vmatprep.subr.bf16.mxu1 %v1398_v5 }
  0x89   :  { %461 = vmatmul.mubr.f32.gmra.mrb[6].mxu1 %v65_v7  ;;  %323 = vmatprep.mubr.f32.mxu0 %v68_v8  ;;  %v755_v7 = vld [vmem:[#allocation7 + $0x138] sm:$0xff] }
  0x8a   :  { %466 = vmatprep.mubr.f32.mxu1 %v68_v8  ;;  %v740_v8 = vld [vmem:[#allocation7 + $0xc0] sm:$0xff] }
  0x8c   :  { %324 = vmatmul.mubr.f32.gmra.mrb[8].mxu0 %v67_v9 }
  0x8d   :  { %467 = vmatmul.mubr.f32.gmra.mrb[8].mxu1 %v67_v9  ;;  %329 = vmatprep.mubr.f32.mxu0 %v70_v10  ;;  %v741_v9 = vld [vmem:[#allocation7 + $0xc8] sm:$0xff] }
  0x8e   :  { %472 = vmatprep.mubr.f32.mxu1 %v70_v10  ;;  %v772_v10 = vld [vmem:[#allocation7 + $0x1c0] sm:$0xff] }
  0x90   :  { %330 = vmatmul.mubr.f32.gmra.mrb[10].mxu0 %v69_v11 }
  0x91   :  { %473 = vmatmul.mubr.f32.gmra.mrb[10].mxu1 %v69_v11  ;;  %335 = vmatprep.mubr.f32.mxu0 %v72_v12  ;;  %v773_v11 = vld [vmem:[#allocation7 + $0x1c8] sm:$0xff] }
  0x92   :  { %478 = vmatprep.mubr.f32.mxu1 %v72_v12  ;;  %v1368_v12 = vpack.c.bf16 %v723_v4, %v722_v3 }
  0x94   :  { %336 = vmatmul.mubr.f32.gmra.mrb[12].mxu0 %v71_v13 }
  0x95   :  { %479 = vmatmul.mubr.f32.gmra.mrb[12].mxu1 %v71_v13  ;;  %341 = vmatprep.mubr.f32.mxu0 %v74_v14  ;;  %v1400_v13 = vpack.c.bf16 %v755_v7, %v754_v6 }
  0x96   :  { %484 = vmatprep.mubr.f32.mxu1 %v74_v14  ;;  %v1370_v14 = vpack.c.bf16 %v741_v9, %v740_v8  ;;  %1369 = vmatpush3.bf16.msra.mxu0 %v1368_v12 }
  0x97   :  { %1401 = vmatpush3.bf16.msra.mxu1 %v1400_v13 }
  0x98   :  { %342 = vmatmul.mubr.f32.gmra.mrb[14].mxu0 %v73_v15  ;;  %1371 = vmatprep.subr.bf16.mxu0 %v1370_v14 }
  0x99   :  { %485 = vmatmul.mubr.f32.gmra.mrb[14].mxu1 %v73_v15  ;;  %347 = vmatprep.mubr.f32.mxu0 %v76_v16  ;;  %v724_v15 = vld [vmem:[#allocation7 + $0x40] sm:$0xff] }
  0x9a   :  { %490 = vmatprep.mubr.f32.mxu1 %v76_v16  ;;  %v725_v16 = vld [vmem:[#allocation7 + $0x48] sm:$0xff] }
  0x9c   :  { %348 = vmatmul.mubr.f32.gmra.mrb[16].mxu0 %v75_v17 }
  0x9d   :  { %491 = vmatmul.mubr.f32.gmra.mrb[16].mxu1 %v75_v17  ;;  %353 = vmatprep.mubr.f32.mxu0 %v78_v18  ;;  %v756_v17 = vld [vmem:[#allocation7 + $0x140] sm:$0xff] }
  0x9e   :  { %496 = vmatprep.mubr.f32.mxu1 %v78_v18  ;;  %v1402_v18 = vpack.c.bf16 %v773_v11, %v772_v10 }
  0xa0   :  { %354 = vmatmul.mubr.f32.gmra.mrb[18].mxu0 %v77_v19  ;;  %1403 = vmatprep.subr.bf16.mxu1 %v1402_v18 }
  0xa1   :  { %497 = vmatmul.mubr.f32.gmra.mrb[18].mxu1 %v77_v19  ;;  %359 = vmatprep.mubr.f32.mxu0 %v80_v20  ;;  %v757_v19 = vld [vmem:[#allocation7 + $0x148] sm:$0xff] }
  0xa2   :  { %502 = vmatprep.mubr.f32.mxu1 %v80_v20  ;;  %v742_v20 = vld [vmem:[#allocation7 + $0xd0] sm:$0xff] }
  0xa4   :  { %360 = vmatmul.mubr.f32.gmra.mrb[20].mxu0 %v79_v21 }
  0xa5   :  { %503 = vmatmul.mubr.f32.gmra.mrb[20].mxu1 %v79_v21  ;;  %365 = vmatprep.mubr.f32.mxu0 %v82_v22  ;;  %v743_v21 = vld [vmem:[#allocation7 + $0xd8] sm:$0xff] }
  0xa6   :  { %508 = vmatprep.mubr.f32.mxu1 %v82_v22  ;;  %v774_v22 = vld [vmem:[#allocation7 + $0x1d0] sm:$0xff]  ;;  %v1374_v26 = vpack.c.bf16 %v743_v21, %v742_v20 }
  0xa8   :  { %366 = vmatmul.mubr.f32.gmra.mrb[22].mxu0 %v81_v23 }
  0xa9   :  { %509 = vmatmul.mubr.f32.gmra.mrb[22].mxu1 %v81_v23  ;;  %371 = vmatprep.mubr.f32.mxu0 %v84_v24  ;;  %v775_v23 = vld [vmem:[#allocation7 + $0x1d8] sm:$0xff] }
  0xaa   :  { %514 = vmatprep.mubr.f32.mxu1 %v84_v24  ;;  %v1372_v24 = vpack.c.bf16 %v725_v16, %v724_v15  ;;  %v1406_v29 = vpack.c.bf16 %v775_v23, %v774_v22 }
  0xac   :  { %372 = vmatmul.mubr.f32.gmra.mrb[24].mxu0 %v83_v25 }
  0xad   :  { %515 = vmatmul.mubr.f32.gmra.mrb[24].mxu1 %v83_v25  ;;  %v1404_v25 = vpack.c.bf16 %v757_v19, %v756_v17  ;;  %1373 = vmatpush3.bf16.msra.mxu0 %v1372_v24 }
  0xae   :  { %1375 = vmatprep.subr.bf16.mxu0 %v1374_v26 }
  0xaf   :  { %1405 = vmatpush3.bf16.msra.mxu1 %v1404_v25 }
  0xb0   :  { %1407 = vmatprep.subr.bf16.mxu1 %v1406_v29 }
  0xb1   :  { %1377 = vmatpush3.bf16.msra.mxu0 %v1376_v32 }
  0xb3   :  { %1409 = vmatpush3.bf16.msra.mxu1 %v1408_v33 }
 0x14f   :  { %v301_v45 = vpop.f32.mrb[0].mxu0 }
 0x150   :  { %v1634_v46 = vadd.f32 %v301_v45, %v1625_v41  ;;  %v303_v47 = vpop.f32.mrb[1].mxu0  ;;  %v444_v48 = vpop.f32.mrb[0].mxu1 }
 0x151   :  { %v1637_v49 = vadd.f32 %v303_v47, %v1627_v42  ;;  %v1640_v50 = vadd.f32 %v444_v48, %v1629_v43  ;;  %v446_v51 = vpop.f32.mrb[1].mxu1 }
 0x152   :  { %v521_v52 = vmul.f32 %v1634_v46, %v1634_v46  ;;  %v1645_v53 = vadd.f32 %v446_v51, %v1631_v44 }
 0x153   :  { %v522_v54 = vmul.f32 %v1637_v49, %v1637_v49  ;;  %v523_v55 = vmul.f32 %v1640_v50, %v1640_v50  ;;  %v307_v56 = vpop.f32.mrb[2].mxu0 }
 0x154   :  { %v1652_v57 = vadd.f32 %v307_v56, %v1625_v41  ;;  %v309_v58 = vpop.f32.mrb[3].mxu0  ;;  %v450_v59 = vpop.f32.mrb[2].mxu1  ;;  %v524_v1 = vmul.f32 %v1645_v53, %v1645_v53 }
 0x155   :  { %v1655_v60 = vadd.f32 %v309_v58, %v1627_v42  ;;  %v1658_v61 = vadd.f32 %v450_v59, %v1629_v43  ;;  %v452_v62 = vpop.f32.mrb[3].mxu1  ;;  %v573_v63 = vadd.f32 %v522_v54, %v521_v52 }
 0x156   :  { %v525_v0 = vmul.f32 %v1652_v57, %v1652_v57  ;;  %v1669_v4 = vadd.f32 %v452_v62, %v1631_v44 }
 0x157   :  { %v526_v2 = vmul.f32 %v1655_v60, %v1655_v60  ;;  %v527_v3 = vmul.f32 %v1658_v61, %v1658_v61  ;;  %v313_v5 = vpop.f32.mrb[4].mxu0  ;;  %v574_v6 = vadd.f32 %v573_v63, %v523_v55 }
 0x158   :  { %v1672_v7 = vadd.f32 %v313_v5, %v1625_v41  ;;  %v315_v8 = vpop.f32.mrb[5].mxu0  ;;  %v456_v9 = vpop.f32.mrb[4].mxu1  ;;  %v528_v17 = vmul.f32 %v1669_v4, %v1669_v4 }
 0x159   :  { %v578_v10 = vadd.f32 %v526_v2, %v525_v0  ;;  %v1675_v11 = vadd.f32 %v315_v8, %v1627_v42  ;;  %v1678_v12 = vadd.f32 %v456_v9, %v1629_v43  ;;  %v458_v13 = vpop.f32.mrb[5].mxu1  ;;  %v575_v14 = vadd.f32 %v574_v6, %v524_v1 }
 0x15a   :  { %v529_v15 = vmul.f32 %v1672_v7, %v1672_v7  ;;  %v1683_v16 = vadd.f32 %v458_v13, %v1631_v44 }
 0x15b   :  { %v530_v18 = vmul.f32 %v1675_v11, %v1675_v11  ;;  %v531_v19 = vmul.f32 %v1678_v12, %v1678_v12  ;;  %v319_v20 = vpop.f32.mrb[6].mxu0  ;;  %576 = vadd.xlane.f32.xlu0 %v575_v14  ;;  %v579_v21 = vadd.f32 %v578_v10, %v527_v3 }
 0x15c   :  { %v1692_v22 = vadd.f32 %v319_v20, %v1625_v41  ;;  %v321_v23 = vpop.f32.mrb[7].mxu0  ;;  %v462_v24 = vpop.f32.mrb[6].mxu1  ;;  %v532_v31 = vmul.f32 %v1683_v16, %v1683_v16 }
 0x15d   :  { %v1695_v25 = vadd.f32 %v321_v23, %v1627_v42  ;;  %v1698_v26 = vadd.f32 %v462_v24, %v1629_v43  ;;  %v464_v27 = vpop.f32.mrb[7].mxu1  ;;  %v580_v28 = vadd.f32 %v579_v21, %v528_v17  ;;  %v583_v29 = vadd.f32 %v530_v18, %v529_v15 }
 0x15e   :  { %v533_v30 = vmul.f32 %v1692_v22, %v1692_v22  ;;  %v1709_v34 = vadd.f32 %v464_v27, %v1631_v44 }
 0x15f   :  { %v534_v32 = vmul.f32 %v1695_v25, %v1695_v25  ;;  %v535_v33 = vmul.f32 %v1698_v26, %v1698_v26  ;;  %v325_v35 = vpop.f32.mrb[8].mxu0  ;;  %581 = vadd.xlane.f32.xlu0 %v580_v28  ;;  %v584_v36 = vadd.f32 %v583_v29, %v531_v19 }
 0x160   :  { %v1712_v37 = vadd.f32 %v325_v35, %v1625_v41  ;;  %v327_v38 = vpop.f32.mrb[9].mxu0  ;;  %v468_v39 = vpop.f32.mrb[8].mxu1  ;;  %v536_v55 = vmul.f32 %v1709_v34, %v1709_v34 }
 0x161   :  { %v588_v40 = vadd.f32 %v534_v32, %v533_v30  ;;  %v1715_v45 = vadd.f32 %v327_v38, %v1627_v42  ;;  %v1718_v47 = vadd.f32 %v468_v39, %v1629_v43  ;;  %v470_v48 = vpop.f32.mrb[9].mxu1  ;;  %v585_v51 = vadd.f32 %v584_v36, %v532_v31  ;;  %v744_v39 = vld [vmem:[#allocation7 + $0xe0] sm:$0xff] }
 0x162   :  { %v537_v52 = vmul.f32 %v1712_v37, %v1712_v37  ;;  %v1723_v54 = vadd.f32 %v470_v48, %v1631_v44  ;;  %v776_v48 = vld [vmem:[#allocation7 + $0x1e0] sm:$0xff] }
 0x163   :  { %v538_v56 = vmul.f32 %v1715_v45, %v1715_v45  ;;  %v539_v58 = vmul.f32 %v1718_v47, %v1718_v47  ;;  %v331_v59 = vpop.f32.mrb[10].mxu0  ;;  %586 = vadd.xlane.f32.xlu1 %v585_v51  ;;  %v589_v62 = vadd.f32 %v588_v40, %v535_v33  ;;  %v745_v40 = vld [vmem:[#allocation7 + $0xe8] sm:$0xff] }
 0x164   :  { %v1732_v63 = vadd.f32 %v331_v59, %v1625_v41  ;;  %v333_v0 = vpop.f32.mrb[11].mxu0  ;;  %v474_v1 = vpop.f32.mrb[10].mxu1  ;;  %v540_v9 = vmul.f32 %v1723_v54, %v1723_v54  ;;  %v777_v59 = vld [vmem:[#allocation7 + $0x1e8] sm:$0xff] }
 0x165   :  { %v593_v2 = vadd.f32 %v538_v56, %v537_v52  ;;  %v1735_v3 = vadd.f32 %v333_v0, %v1627_v42  ;;  %v1738_v5 = vadd.f32 %v474_v1, %v1629_v43  ;;  %v476_v6 = vpop.f32.mrb[11].mxu1  ;;  %v590_v8 = vadd.f32 %v589_v62, %v536_v55  ;;  %v728_v62 = vld [vmem:[#allocation7 + $0x60] sm:$0xff]  ;;  %v729_v0 = vld [vmem:[#allocation7 + $0x68] sm:$0xff] }
 0x166   :  { %v541_v10 = vmul.f32 %v1732_v63, %v1732_v63  ;;  %v1749_v15 = vadd.f32 %v476_v6, %v1631_v44 }
 0x167   :  { %v542_v13 = vmul.f32 %v1735_v3, %v1735_v3  ;;  %v543_v14 = vmul.f32 %v1738_v5, %v1738_v5  ;;  %v337_v17 = vpop.f32.mrb[12].mxu0  ;;  %591 = vadd.xlane.f32.xlu1 %v590_v8  ;;  %v594_v18 = vadd.f32 %v593_v2, %v539_v58  ;;  %v1378_v58 = vpack.c.bf16 %v745_v40, %v744_v39 }
 0x168   :  { %v1752_v19 = vadd.f32 %v337_v17, %v1625_v41  ;;  %v339_v20 = vpop.f32.mrb[13].mxu0  ;;  %v480_v21 = vpop.f32.mrb[12].mxu1  ;;  %v544_v32 = vmul.f32 %v1749_v15, %v1749_v15 }
 0x169   :  { %v598_v23 = vadd.f32 %v542_v13, %v541_v10  ;;  %v1755_v24 = vadd.f32 %v339_v20, %v1627_v42  ;;  %v1758_v27 = vadd.f32 %v480_v21, %v1629_v43  ;;  %v482_v28 = vpop.f32.mrb[13].mxu1  ;;  %v595_v29 = vadd.f32 %v594_v18, %v540_v9  ;;  %v760_v10 = vld [vmem:[#allocation7 + $0x160] sm:$0xff]  ;;  %v761_v13 = vld [vmem:[#allocation7 + $0x168] sm:$0xff]  ;;  %1379 = vmatprep.subr.bf16.mxu0 %v1378_v58 }
 0x16a   :  { %v545_v30 = vmul.f32 %v1752_v19, %v1752_v19  ;;  %v1763_v31 = vadd.f32 %v482_v28, %v1631_v44  ;;  %v1410_v18 = vpack.c.bf16 %v777_v59, %v776_v48  ;;  %v1380_v20 = vpack.c.bf16 %v729_v0, %v728_v62  ;;  %v746_v59 = vld [vmem:[#allocation7 + $0xf0] sm:$0xff]  ;;  %v747_v62 = vld [vmem:[#allocation7 + $0xf8] sm:$0xff] }
 0x16b   :  { %v546_v33 = vmul.f32 %v1755_v24, %v1755_v24  ;;  %v547_v35 = vmul.f32 %v1758_v27, %v1758_v27  ;;  %v343_v36 = vpop.f32.mrb[14].mxu0  ;;  %596 = vadd.xlane.f32.xlu0 %v595_v29  ;;  %v599_v38 = vadd.f32 %v598_v23, %v543_v14  ;;  %v778_v0 = vld [vmem:[#allocation7 + $0x1f0] sm:$0xff] }
 0x16c   :  { %v548_v51 = vmul.f32 %v1763_v31, %v1763_v31  ;;  %v1774_v52 = vadd.f32 %v343_v36, %v1625_v41  ;;  %v345_v55 = vpop.f32.mrb[15].mxu0  ;;  %v486_v56 = vpop.f32.mrb[14].mxu1  ;;  %1411 = vmatprep.subr.bf16.mxu1 %v1410_v18  ;;  %1381 = vmatpush3.bf16.msra.mxu0 %v1380_v20  ;;  %v731_v18 = vld [vmem:[#allocation7 + $0x78] sm:$0xff] }
 0x16d   :  { %v603_v1 = vadd.f32 %v546_v33, %v545_v30  ;;  %v1777_v2 = vadd.f32 %v345_v55, %v1627_v42  ;;  %v1780_v6 = vadd.f32 %v486_v56, %v1629_v43  ;;  %v488_v8 = vpop.f32.mrb[15].mxu1  ;;  %v600_v9 = vadd.f32 %v599_v38, %v544_v32 }
 0x16e   :  { %v549_v14 = vmul.f32 %v1774_v52, %v1774_v52  ;;  %v1785_v17 = vadd.f32 %v488_v8, %v1631_v44  ;;  %v1412_v30 = vpack.c.bf16 %v761_v13, %v760_v10  ;;  %v1382_v10 = vpack.c.bf16 %v747_v62, %v746_v59  ;;  %v779_v13 = vld [vmem:[#allocation7 + $0x1f8] sm:$0xff] }
 0x16f   :  { %v550_v21 = vmul.f32 %v1777_v2, %v1777_v2  ;;  %v551_v23 = vmul.f32 %v1780_v6, %v1780_v6  ;;  %v349_v28 = vpop.f32.mrb[16].mxu0  ;;  %601 = vadd.xlane.f32.xlu1 %v600_v9  ;;  %v604_v29 = vadd.f32 %v603_v1, %v547_v35 }
 0x170   :  { %v1792_v32 = vadd.f32 %v349_v28, %v1625_v41  ;;  %v351_v33 = vpop.f32.mrb[17].mxu0  ;;  %v492_v36 = vpop.f32.mrb[16].mxu1  ;;  %1413 = vmatpush3.bf16.msra.mxu1 %v1412_v30  ;;  %v552_v35 = vmul.f32 %v1785_v17, %v1785_v17  ;;  %1383 = vmatprep.subr.bf16.mxu0 %v1382_v10 }
 0x171   :  { %v608_v38 = vadd.f32 %v550_v21, %v549_v14  ;;  %v1795_v39 = vadd.f32 %v351_v33, %v1627_v42  ;;  %v1798_v40 = vadd.f32 %v492_v36, %v1629_v43  ;;  %v494_v48 = vpop.f32.mrb[17].mxu1  ;;  %v605_v55 = vadd.f32 %v604_v29, %v548_v51  ;;  %v730_v14 = vld [vmem:[#allocation7 + $0x70] sm:$0xff]  ;;  %v763_v36 = vld [vmem:[#allocation7 + $0x178] sm:$0xff] }
 0x172   :  { %1973 = vst [vmem:[#allocation12_spill] sm:$0xff] %v1792_v32  ;;  %v553_v56 = vmul.f32 %v1792_v32, %v1792_v32  ;;  %v1805_v58 = vadd.f32 %v494_v48, %v1631_v44  ;;  %v1414_v29 = vpack.c.bf16 %v779_v13, %v778_v0  ;;  %v1384_v30 = vpack.c.bf16 %v731_v18, %v730_v14  ;;  %v762_v33 = vld [vmem:[#allocation7 + $0x170] sm:$0xff] }
 0x173   :  { %v554_v1 = vmul.f32 %v1795_v39, %v1795_v39  ;;  %v555_v8 = vmul.f32 %v1798_v40, %v1798_v40  ;;  %v355_v51 = vpop.f32.mrb[18].mxu0  ;;  %606 = vadd.xlane.f32.xlu0 %v605_v55  ;;  %v609_v9 = vadd.f32 %v608_v38, %v551_v23  ;;  %v1416_v0 = vpack.c.bf16 %v763_v36, %v762_v33 }
 0x174   :  { %v1812_v20 = vadd.f32 %v355_v51, %v1625_v41  ;;  %v357_v21 = vpop.f32.mrb[19].mxu0  ;;  %v498_v28 = vpop.f32.mrb[18].mxu1  ;;  %1415 = vmatprep.subr.bf16.mxu1 %v1414_v29  ;;  %1385 = vmatpush3.bf16.msra.mxu0 %v1384_v30 }
 0x175   :  { %v613_v48 = vadd.f32 %v554_v1, %v553_v56  ;;  %v1815_v32 = vadd.f32 %v357_v21, %v1627_v42  ;;  %v1818_v55 = vadd.f32 %v498_v28, %v1629_v43  ;;  %v500_v23 = vpop.f32.mrb[19].mxu1  ;;  %v610_v38 = vadd.f32 %v609_v9, %v552_v35  ;;  %1417 = vmatpush3.bf16.msra.mxu1 %v1416_v0 }
 0x176   :  { %v557_v59 = vmul.f32 %v1812_v20, %v1812_v20  ;;  %v1823_v62 = vadd.f32 %v500_v23, %v1631_v44  ;;  %v556_v56 = vmul.f32 %v1805_v58, %v1805_v58 }
 0x177   :  { %v558_v1 = vmul.f32 %v1815_v32, %v1815_v32  ;;  %v559_v51 = vmul.f32 %v1818_v55, %v1818_v55  ;;  %v361_v35 = vpop.f32.mrb[20].mxu0  ;;  %611 = vadd.xlane.f32.xlu1 %v610_v38  ;;  %v614_v9 = vadd.f32 %v613_v48, %v555_v8 }
 0x178   :  { %v1832_v10 = vadd.f32 %v361_v35, %v1625_v41  ;;  %v363_v13 = vpop.f32.mrb[21].mxu0  ;;  %v504_v14 = vpop.f32.mrb[20].mxu1  ;;  %v560_v33 = vmul.f32 %v1823_v62, %v1823_v62 }
 0x179   :  { %v618_v18 = vadd.f32 %v558_v1, %v557_v59  ;;  %v1835_v21 = vadd.f32 %v363_v13, %v1627_v42  ;;  %v1838_v28 = vadd.f32 %v504_v14, %v1629_v43  ;;  %v506_v29 = vpop.f32.mrb[21].mxu1  ;;  %v615_v30 = vadd.f32 %v614_v9, %v556_v56 }
 0x17a   :  { %1974 = vst [vmem:[#allocation13_spill] sm:$0xff] %v1832_v10  ;;  %v561_v8 = vmul.f32 %v1832_v10, %v1832_v10  ;;  %v1849_v23 = vadd.f32 %v506_v29, %v1631_v44 }
 0x17b   :  { %1975 = vst [vmem:[#allocation14_spill] sm:$0xff] %v1838_v28  ;;  %v562_v36 = vmul.f32 %v1835_v21, %v1835_v21  ;;  %v563_v48 = vmul.f32 %v1838_v28, %v1838_v28  ;;  %v367_v38 = vpop.f32.mrb[22].mxu0  ;;  %616 = vadd.xlane.f32.xlu0 %v615_v30  ;;  %v619_v59 = vadd.f32 %v618_v18, %v559_v51 }
 0x17c   :  { %v1852_v0 = vadd.f32 %v367_v38, %v1625_v41  ;;  %v369_v56 = vpop.f32.mrb[23].mxu0  ;;  %v510_v1 = vpop.f32.mrb[22].mxu1  ;;  %v564_v51 = vmul.f32 %v1849_v23, %v1849_v23 }
 0x17d   :  { %v623_v35 = vadd.f32 %v562_v36, %v561_v8  ;;  %v1855_v9 = vadd.f32 %v369_v56, %v1627_v42  ;;  %v1858_v13 = vadd.f32 %v510_v1, %v1629_v43  ;;  %v512_v14 = vpop.f32.mrb[23].mxu1  ;;  %v620_v28 = vadd.f32 %v619_v59, %v560_v33 }
 0x17e   :  { %1976 = vst [vmem:[#allocation15_spill] sm:$0xff] %v1852_v0  ;;  %v565_v29 = vmul.f32 %v1852_v0, %v1852_v0  ;;  %v1863_v30 = vadd.f32 %v512_v14, %v1631_v44 }
 0x17f   :  { %1977 = vst [vmem:[#allocation16_spill] sm:$0xff] %v1855_v9  ;;  %1978 = vst [vmem:[#allocation17_spill] sm:$0xff] %v1858_v13  ;;  %v566_v18 = vmul.f32 %v1855_v9, %v1855_v9  ;;  %v567_v8 = vmul.f32 %v1858_v13, %v1858_v13  ;;  %v373_v36 = vpop.f32.mrb[24].mxu0  ;;  %621 = vadd.xlane.f32.xlu1 %v620_v28  ;;  %v624_v38 = vadd.f32 %v623_v35, %v563_v48 }
 0x180   :  { %v1872_v33 = vadd.f32 %v373_v36, %v1625_v41  ;;  %v375_v59 = vpop.f32.mrb[25].mxu0  ;;  %v516_v56 = vpop.f32.mrb[24].mxu1  ;;  %v568_v13 = vmul.f32 %v1863_v30, %v1863_v30 }
 0x181   :  { %v628_v1 = vadd.f32 %v566_v18, %v565_v29  ;;  %v1875_v14 = vadd.f32 %v375_v59, %v1627_v42  ;;  %v1878_v0 = vadd.f32 %v516_v56, %v1629_v43  ;;  %v518_v10 = vpop.f32.mrb[25].mxu1  ;;  %v625_v9 = vadd.f32 %v624_v38, %v564_v51 }
 0x182   :  { %1979 = vst [vmem:[#allocation18_spill] sm:$0xff] %v1872_v33  ;;  %v569_v28 = vmul.f32 %v1872_v33, %v1872_v33  ;;  %v1889_v42 = vadd.f32 %v518_v10, %v1631_v44 }
 0x183   :  { %1980 = vst [vmem:[#allocation19_spill] sm:$0xff] %v1878_v0  ;;  %v570_v41 = vmul.f32 %v1875_v14, %v1875_v14  ;;  %v571_v48 = vmul.f32 %v1878_v0, %v1878_v0  ;;  %626 = vadd.xlane.f32.xlu0 %v625_v9  ;;  %v629_v43 = vadd.f32 %v628_v1, %v567_v8 }
 0x184   :  { %v572_v51 = vmul.f32 %v1889_v42, %v1889_v42 }
 0x185   :  { %v633_v35 = vadd.f32 %v570_v41, %v569_v28  ;;  %v630_v29 = vadd.f32 %v629_v43, %v568_v13 }
 0x187   :  { %631 = vadd.xlane.f32.xlu1 %v630_v29  ;;  %v634_v18 = vadd.f32 %v633_v35, %v571_v48 }
 0x189   :  { %v635_v36 = vadd.f32 %v634_v18, %v572_v51 }
 0x18b   :  { %636 = vadd.xlane.f32.xlu0 %v635_v36 }
 0x1e8   :  { %v577_v38 = vpop.xlane.xlu0 %576 }
 0x1e9   :  { %v638_v59 = vmax.f32 %v577_v38, 1e-24 }
 0x1eb   :  { %1428 = vrsqrt.f32 %v638_v59 }
 0x1ec   :  { %v582_v56 = vpop.xlane.xlu0 %581 }
 0x1ed   :  { %v639_v33 = vmax.f32 %v582_v56, 1e-24 }
 0x1ef   :  { %1430 = vrsqrt.f32 %v639_v33 }
 0x1f0   :  { %v587_v0 = vpop.xlane.xlu1 %586 }
 0x1f1   :  { %v640_v44 = vmax.f32 %v587_v0, 1e-24 }
 0x1f3   :  { %1432 = vrsqrt.f32 %v640_v44 }
 0x1f4   :  { %v592_v10 = vpop.xlane.xlu1 %591 }
 0x1f5   :  { %v1429_v9 = vpop.eup %1428  ;;  %v641_v8 = vmax.f32 %v592_v10, 1e-24 }
 0x1f6   :  { %v665_v13 = vmul.f32 %v1429_v9, %v1637_v49  ;;  %v667_v1 = vmul.f32 %v1429_v9, %v1645_v53  ;;  %v664_v28 = vmul.f32 %v1429_v9, %v1634_v46  ;;  %v666_v41 = vmul.f32 %v1429_v9, %v1640_v50 }
 0x1f7   :  { %1434 = vrsqrt.f32 %v641_v8 }
 0x1f8   :  { %844 = vmatprep.mubr.f32.mxu0 %v665_v13  ;;  %974 = vmatprep.mubr.f32.mxu1 %v667_v1  ;;  %v597_v48 = vpop.xlane.xlu0 %596 }
 0x1f9   :  { %v1431_v43 = vpop.eup %1430  ;;  %v642_v33 = vmax.f32 %v597_v48, 1e-24  ;;  %845 = vmatmul.mubr.f32.vlgmr.msra.gmra.mrb[26].mxu0 %v664_v28  ;;  %975 = vmatmul.mubr.f32.vlgmr.msra.gmra.mrb[26].mxu1 %v666_v41 }
 0x1fa   :  { %v669_v0 = vmul.f32 %v1431_v43, %v1655_v60  ;;  %v671_v35 = vmul.f32 %v1431_v43, %v1669_v4  ;;  %v668_v49 = vmul.f32 %v1431_v43, %v1652_v57  ;;  %v670_v53 = vmul.f32 %v1431_v43, %v1658_v61 }
 0x1fb   :  { %1436 = vrsqrt.f32 %v642_v33 }
 0x1fc   :  { %v602_v46 = vpop.xlane.xlu1 %601  ;;  %849 = vmatprep.mubr.f32.mxu0 %v669_v0  ;;  %979 = vmatprep.mubr.f32.mxu1 %v671_v35 }
 0x1fd   :  { %v1433_v50 = vpop.eup %1432  ;;  %v643_v29 = vmax.f32 %v602_v46, 1e-24  ;;  %850 = vmatmul.mubr.f32.gmra.mrb[28].mxu0 %v668_v49  ;;  %980 = vmatmul.mubr.f32.gmra.mrb[28].mxu1 %v670_v53  ;;  %v1981_v53 = vld [vmem:[#allocation12_spill] sm:$0xff] }
 0x1fe   :  { %v673_v51 = vmul.f32 %v1433_v50, %v1675_v11  ;;  %v675_v18 = vmul.f32 %v1433_v50, %v1683_v16  ;;  %v672_v60 = vmul.f32 %v1433_v50, %v1672_v7  ;;  %v674_v4 = vmul.f32 %v1433_v50, %v1678_v12 }
 0x1ff   :  { %1438 = vrsqrt.f32 %v643_v29 }
 0x200   :  { %854 = vmatprep.mubr.f32.mxu0 %v673_v51  ;;  %984 = vmatprep.mubr.f32.mxu1 %v675_v18  ;;  %v607_v57 = vpop.xlane.xlu0 %606 }
 0x201   :  { %v1435_v61 = vpop.eup %1434  ;;  %v644_v36 = vmax.f32 %v607_v57, 1e-24  ;;  %855 = vmatmul.mubr.f32.gmra.mrb[30].mxu0 %v672_v60  ;;  %985 = vmatmul.mubr.f32.gmra.mrb[30].mxu1 %v674_v4  ;;  %v1982_v60 = vld [vmem:[#allocation13_spill] sm:$0xff]  ;;  %v1983_v57 = vld [vmem:[#allocation14_spill] sm:$0xff] }
 0x202   :  { %v677_v38 = vmul.f32 %v1435_v61, %v1695_v25  ;;  %v679_v59 = vmul.f32 %v1435_v61, %v1709_v34  ;;  %v676_v11 = vmul.f32 %v1435_v61, %v1692_v22  ;;  %v678_v16 = vmul.f32 %v1435_v61, %v1698_v26 }
 0x203   :  { %1440 = vrsqrt.f32 %v644_v36  ;;  %v1985_v36 = vld [vmem:[#allocation15_spill] sm:$0xff] }
 0x204   :  { %v612_v7 = vpop.xlane.xlu1 %611  ;;  %859 = vmatprep.mubr.f32.mxu0 %v677_v38  ;;  %989 = vmatprep.mubr.f32.mxu1 %v679_v59  ;;  %v1986_v59 = vld [vmem:[#allocation17_spill] sm:$0xff] }
 0x205   :  { %v1437_v12 = vpop.eup %1436  ;;  %v645_v56 = vmax.f32 %v612_v7, 1e-24  ;;  %860 = vmatmul.mubr.f32.gmra.mrb[32].mxu0 %v676_v11  ;;  %990 = vmatmul.mubr.f32.gmra.mrb[32].mxu1 %v678_v16  ;;  %v1987_v7 = vld [vmem:[#allocation18_spill] sm:$0xff] }
 0x206   :  { %v681_v44 = vmul.f32 %v1437_v12, %v1715_v45  ;;  %v683_v10 = vmul.f32 %v1437_v12, %v1723_v54  ;;  %v680_v25 = vmul.f32 %v1437_v12, %v1712_v37  ;;  %v682_v34 = vmul.f32 %v1437_v12, %v1718_v47 }
 0x207   :  { %1442 = vrsqrt.f32 %v645_v56  ;;  %v1988_v56 = vld [vmem:[#allocation19_spill] sm:$0xff] }
 0x208   :  { %864 = vmatprep.mubr.f32.mxu0 %v681_v44  ;;  %994 = vmatprep.mubr.f32.mxu1 %v683_v10  ;;  %v617_v22 = vpop.xlane.xlu0 %616 }
 0x209   :  { %v1439_v26 = vpop.eup %1438  ;;  %v646_v9 = vmax.f32 %v617_v22, 1e-24  ;;  %865 = vmatmul.mubr.f32.gmra.mrb[34].mxu0 %v680_v25  ;;  %995 = vmatmul.mubr.f32.gmra.mrb[34].mxu1 %v682_v34 }
 0x20a   :  { %v685_v8 = vmul.f32 %v1439_v26, %v1735_v3  ;;  %v687_v13 = vmul.f32 %v1439_v26, %v1749_v15  ;;  %v684_v45 = vmul.f32 %v1439_v26, %v1732_v63  ;;  %v686_v54 = vmul.f32 %v1439_v26, %v1738_v5 }
 0x20b   :  { %1444 = vrsqrt.f32 %v646_v9 }
 0x20c   :  { %v622_v37 = vpop.xlane.xlu1 %621  ;;  %869 = vmatprep.mubr.f32.mxu0 %v685_v8  ;;  %999 = vmatprep.mubr.f32.mxu1 %v687_v13 }
 0x20d   :  { %v1441_v47 = vpop.eup %1440  ;;  %v647_v1 = vmax.f32 %v622_v37, 1e-24  ;;  %870 = vmatmul.mubr.f32.gmra.mrb[36].mxu0 %v684_v45  ;;  %1000 = vmatmul.mubr.f32.gmra.mrb[36].mxu1 %v686_v54 }
 0x20e   :  { %v689_v28 = vmul.f32 %v1441_v47, %v1755_v24  ;;  %v691_v41 = vmul.f32 %v1441_v47, %v1763_v31  ;;  %v688_v3 = vmul.f32 %v1441_v47, %v1752_v19  ;;  %v690_v15 = vmul.f32 %v1441_v47, %v1758_v27 }
 0x20f   :  { %1446 = vrsqrt.f32 %v647_v1 }
 0x210   :  { %874 = vmatprep.mubr.f32.mxu0 %v689_v28  ;;  %1004 = vmatprep.mubr.f32.mxu1 %v691_v41  ;;  %v627_v63 = vpop.xlane.xlu0 %626 }
 0x211   :  { %v1443_v5 = vpop.eup %1442  ;;  %v648_v48 = vmax.f32 %v627_v63, 1e-24  ;;  %875 = vmatmul.mubr.f32.gmra.mrb[38].mxu0 %v688_v3  ;;  %1005 = vmatmul.mubr.f32.gmra.mrb[38].mxu1 %v690_v15 }
 0x212   :  { %v693_v43 = vmul.f32 %v1443_v5, %v1777_v2  ;;  %v695_v33 = vmul.f32 %v1443_v5, %v1785_v17  ;;  %v692_v24 = vmul.f32 %v1443_v5, %v1774_v52  ;;  %v694_v31 = vmul.f32 %v1443_v5, %v1780_v6 }
 0x213   :  { %1448 = vrsqrt.f32 %v648_v48 }
 0x214   :  { %v632_v19 = vpop.xlane.xlu1 %631  ;;  %879 = vmatprep.mubr.f32.mxu0 %v693_v43  ;;  %1009 = vmatprep.mubr.f32.mxu1 %v695_v33 }
 0x215   :  { %v1445_v27 = vpop.eup %1444  ;;  %v649_v0 = vmax.f32 %v632_v19, 1e-24  ;;  %880 = vmatmul.mubr.f32.gmra.mrb[40].mxu0 %v692_v24  ;;  %1010 = vmatmul.mubr.f32.gmra.mrb[40].mxu1 %v694_v31 }
 0x216   :  { %v697_v35 = vmul.f32 %v1445_v27, %v1795_v39  ;;  %v699_v49 = vmul.f32 %v1445_v27, %v1805_v58  ;;  %v696_v2 = vmul.f32 %v1445_v27, %v1981_v53  ;;  %v698_v17 = vmul.f32 %v1445_v27, %v1798_v40 }
 0x217   :  { %1450 = vrsqrt.f32 %v649_v0 }
 0x218   :  { %884 = vmatprep.mubr.f32.mxu0 %v697_v35  ;;  %1014 = vmatprep.mubr.f32.mxu1 %v699_v49  ;;  %v637_v52 = vpop.xlane.xlu0 %636 }
 0x219   :  { %v1447_v6 = vpop.eup %1446  ;;  %v650_v46 = vmax.f32 %v637_v52, 1e-24  ;;  %885 = vmatmul.mubr.f32.gmra.mrb[42].mxu0 %v696_v2  ;;  %1015 = vmatmul.mubr.f32.gmra.mrb[42].mxu1 %v698_v17 }
 0x21a   :  { %v701_v50 = vmul.f32 %v1447_v6, %v1815_v32  ;;  %v703_v29 = vmul.f32 %v1447_v6, %v1823_v62  ;;  %v700_v39 = vmul.f32 %v1447_v6, %v1812_v20  ;;  %v702_v58 = vmul.f32 %v1447_v6, %v1818_v55  ;;  %v1984_v20 = vld [vmem:[#allocation16_spill] sm:$0xff] }
 0x21b   :  { %1452 = vrsqrt.f32 %v650_v46 }
 0x21c   :  { %889 = vmatprep.mubr.f32.mxu0 %v701_v50  ;;  %1019 = vmatprep.mubr.f32.mxu1 %v703_v29 }
 0x21d   :  { %v1449_v40 = vpop.eup %1448  ;;  %890 = vmatmul.mubr.f32.gmra.mrb[44].mxu0 %v700_v39  ;;  %1020 = vmatmul.mubr.f32.gmra.mrb[44].mxu1 %v702_v58 }
 0x21e   :  { %v705_v51 = vmul.f32 %v1449_v40, %v1835_v21  ;;  %v707_v18 = vmul.f32 %v1449_v40, %v1849_v23  ;;  %v704_v4 = vmul.f32 %v1449_v40, %v1982_v60  ;;  %v706_v32 = vmul.f32 %v1449_v40, %v1983_v57 }
 0x220   :  { %894 = vmatprep.mubr.f32.mxu0 %v705_v51  ;;  %1024 = vmatprep.mubr.f32.mxu1 %v707_v18 }
 0x221   :  { %v1451_v62 = vpop.eup %1450  ;;  %895 = vmatmul.mubr.f32.gmra.mrb[46].mxu0 %v704_v4  ;;  %1025 = vmatmul.mubr.f32.gmra.mrb[46].mxu1 %v706_v32 }
 0x222   :  { %v709_v55 = vmul.f32 %v1451_v62, %v1984_v20  ;;  %v711_v61 = vmul.f32 %v1451_v62, %v1863_v30  ;;  %v708_v38 = vmul.f32 %v1451_v62, %v1985_v36  ;;  %v710_v11 = vmul.f32 %v1451_v62, %v1986_v59 }
 0x224   :  { %899 = vmatprep.mubr.f32.mxu0 %v709_v55  ;;  %1029 = vmatprep.mubr.f32.mxu1 %v711_v61 }
 0x225   :  { %v1453_v21 = vpop.eup %1452  ;;  %900 = vmatmul.mubr.f32.gmra.mrb[48].mxu0 %v708_v38  ;;  %1030 = vmatmul.mubr.f32.gmra.mrb[48].mxu1 %v710_v11 }
 0x226   :  { %v713_v23 = vmul.f32 %v1453_v21, %v1875_v14  ;;  %v715_v16 = vmul.f32 %v1453_v21, %v1889_v42  ;;  %v712_v12 = vmul.f32 %v1453_v21, %v1987_v7  ;;  %v714_v44 = vmul.f32 %v1453_v21, %v1988_v56 }
 0x228   :  { %904 = vmatprep.mubr.f32.mxu0 %v713_v23  ;;  %1034 = vmatprep.mubr.f32.mxu1 %v715_v16 }
 0x229   :  { %905 = vmatmul.mubr.f32.gmra.mrb[50].mxu0 %v712_v12  ;;  %1035 = vmatmul.mubr.f32.gmra.mrb[50].mxu1 %v714_v44 }
 0x2cc   :  { %v1116_v30 = vpop.f32.mrb[26].mxu0  ;;  %v1187_v10 = vpop.f32.mrb[26].mxu1 }
 0x2cd   :  { %v1117_v25 = vpop.f32.mrb[27].mxu0  ;;  %v1188_v34 = vpop.f32.mrb[27].mxu1 }
 0x2ce   :  { %v1118_v22 = vadd.f32 %v1117_v25, %v1116_v30  ;;  %v1189_v26 = vadd.f32 %v1188_v34, %v1187_v10 }
 0x2d0   :  { %v977_v9 = vadd.f32 %v1189_v26, %v1118_v22  ;;  %v1119_v8 = vpop.f32.mrb[28].mxu0  ;;  %v1190_v13 = vpop.f32.mrb[28].mxu1 }
 0x2d1   :  { %v1120_v14 = vpop.f32.mrb[29].mxu0  ;;  %v1191_v45 = vpop.f32.mrb[29].mxu1 }
 0x2d2   :  { %v1040_v42 = vmul.f32 20.0, %v977_v9  ;;  %v1121_v54 = vadd.f32 %v1120_v14, %v1119_v8  ;;  %v1192_v37 = vadd.f32 %v1191_v45, %v1190_v13 }
 0x2d4   :  { %1053 = vst [vmem:[#allocation8] sm:$0xff] %v1040_v42  ;;  %v982_v47 = vadd.f32 %v1192_v37, %v1121_v54  ;;  %v1122_v1 = vpop.f32.mrb[30].mxu0  ;;  %v1193_v28 = vpop.f32.mrb[30].mxu1 }
 0x2d5   :  { %v1123_v41 = vpop.f32.mrb[31].mxu0  ;;  %v1194_v3 = vpop.f32.mrb[31].mxu1 }
 0x2d6   :  { %v1041_v15 = vmul.f32 20.0, %v982_v47  ;;  %v1124_v63 = vadd.f32 %v1123_v41, %v1122_v1  ;;  %v1195_v5 = vadd.f32 %v1194_v3, %v1193_v28 }
 0x2d8   :  { %1054 = vst [vmem:[#allocation8 + $0x8] sm:$0xff] %v1041_v15  ;;  %v987_v48 = vadd.f32 %v1195_v5, %v1124_v63  ;;  %v1125_v43 = vpop.f32.mrb[32].mxu0  ;;  %v1196_v33 = vpop.f32.mrb[32].mxu1 }
 0x2d9   :  { %v1126_v24 = vpop.f32.mrb[33].mxu0  ;;  %v1197_v31 = vpop.f32.mrb[33].mxu1 }
 0x2da   :  { %v1042_v19 = vmul.f32 20.0, %v987_v48  ;;  %v1127_v27 = vadd.f32 %v1126_v24, %v1125_v43  ;;  %v1198_v0 = vadd.f32 %v1197_v31, %v1196_v33 }
 0x2dc   :  { %1055 = vst [vmem:[#allocation8 + $0x10] sm:$0xff] %v1042_v19  ;;  %v992_v35 = vadd.f32 %v1198_v0, %v1127_v27  ;;  %v1128_v49 = vpop.f32.mrb[34].mxu0  ;;  %v1199_v53 = vpop.f32.mrb[34].mxu1 }
 0x2dd   :  { %v1129_v2 = vpop.f32.mrb[35].mxu0  ;;  %v1200_v17 = vpop.f32.mrb[35].mxu1 }
 0x2de   :  { %v1043_v52 = vmul.f32 20.0, %v992_v35  ;;  %v1130_v6 = vadd.f32 %v1129_v2, %v1128_v49  ;;  %v1201_v46 = vadd.f32 %v1200_v17, %v1199_v53 }
 0x2e0   :  { %1056 = vst [vmem:[#allocation8 + $0x18] sm:$0xff] %v1043_v52  ;;  %v997_v50 = vadd.f32 %v1201_v46, %v1130_v6  ;;  %v1131_v29 = vpop.f32.mrb[36].mxu0  ;;  %v1202_v39 = vpop.f32.mrb[36].mxu1 }
 0x2e1   :  { %v1132_v58 = vpop.f32.mrb[37].mxu0  ;;  %v1203_v40 = vpop.f32.mrb[37].mxu1 }
 0x2e2   :  { %v1044_v51 = vmul.f32 20.0, %v997_v50  ;;  %v1133_v18 = vadd.f32 %v1132_v58, %v1131_v29  ;;  %v1204_v60 = vadd.f32 %v1203_v40, %v1202_v39 }
 0x2e4   :  { %1057 = vst [vmem:[#allocation8 + $0x20] sm:$0xff] %v1044_v51  ;;  %v1002_v4 = vadd.f32 %v1204_v60, %v1133_v18  ;;  %v1134_v57 = vpop.f32.mrb[38].mxu0  ;;  %v1205_v32 = vpop.f32.mrb[38].mxu1 }
 0x2e5   :  { %v1135_v62 = vpop.f32.mrb[39].mxu0  ;;  %v1206_v20 = vpop.f32.mrb[39].mxu1 }
 0x2e6   :  { %v1045_v55 = vmul.f32 20.0, %v1002_v4  ;;  %v1136_v61 = vadd.f32 %v1135_v62, %v1134_v57  ;;  %v1207_v36 = vadd.f32 %v1206_v20, %v1205_v32 }
 0x2e8   :  { %1058 = vst [vmem:[#allocation8 + $0x28] sm:$0xff] %v1045_v55  ;;  %v1007_v38 = vadd.f32 %v1207_v36, %v1136_v61  ;;  %v1137_v59 = vpop.f32.mrb[40].mxu0  ;;  %v1208_v11 = vpop.f32.mrb[40].mxu1 }
 0x2e9   :  { %v1138_v21 = vpop.f32.mrb[41].mxu0  ;;  %v1209_v23 = vpop.f32.mrb[41].mxu1 }
 0x2ea   :  { %v1046_v16 = vmul.f32 20.0, %v1007_v38  ;;  %v1139_v7 = vadd.f32 %v1138_v21, %v1137_v59  ;;  %v1210_v12 = vadd.f32 %v1209_v23, %v1208_v11 }
 0x2ec   :  { %1059 = vst [vmem:[#allocation8 + $0x30] sm:$0xff] %v1046_v16  ;;  %v1012_v56 = vadd.f32 %v1210_v12, %v1139_v7  ;;  %v1140_v44 = vpop.f32.mrb[42].mxu0  ;;  %v1211_v30 = vpop.f32.mrb[42].mxu1 }
 0x2ed   :  { %v1141_v10 = vpop.f32.mrb[43].mxu0  ;;  %v1212_v25 = vpop.f32.mrb[43].mxu1 }
 0x2ee   :  { %v1047_v34 = vmul.f32 20.0, %v1012_v56  ;;  %v1142_v22 = vadd.f32 %v1141_v10, %v1140_v44  ;;  %v1213_v26 = vadd.f32 %v1212_v25, %v1211_v30 }
 0x2f0   :  { %1060 = vst [vmem:[#allocation8 + $0x38] sm:$0xff] %v1047_v34  ;;  %v1017_v9 = vadd.f32 %v1213_v26, %v1142_v22  ;;  %v1143_v8 = vpop.f32.mrb[44].mxu0  ;;  %v1214_v13 = vpop.f32.mrb[44].mxu1 }
 0x2f1   :  { %v1144_v14 = vpop.f32.mrb[45].mxu0  ;;  %v1215_v45 = vpop.f32.mrb[45].mxu1 }
 0x2f2   :  { %v1048_v42 = vmul.f32 20.0, %v1017_v9  ;;  %v1145_v54 = vadd.f32 %v1144_v14, %v1143_v8  ;;  %v1216_v37 = vadd.f32 %v1215_v45, %v1214_v13 }
 0x2f4   :  { %1061 = vst [vmem:[#allocation8 + $0x40] sm:$0xff] %v1048_v42  ;;  %v1022_v47 = vadd.f32 %v1216_v37, %v1145_v54  ;;  %v1146_v1 = vpop.f32.mrb[46].mxu0  ;;  %v1217_v28 = vpop.f32.mrb[46].mxu1 }
 0x2f5   :  { %v1147_v41 = vpop.f32.mrb[47].mxu0  ;;  %v1218_v3 = vpop.f32.mrb[47].mxu1 }
 0x2f6   :  { %v1049_v15 = vmul.f32 20.0, %v1022_v47  ;;  %v1148_v63 = vadd.f32 %v1147_v41, %v1146_v1  ;;  %v1219_v5 = vadd.f32 %v1218_v3, %v1217_v28 }
 0x2f8   :  { %1062 = vst [vmem:[#allocation8 + $0x48] sm:$0xff] %v1049_v15  ;;  %v1027_v48 = vadd.f32 %v1219_v5, %v1148_v63  ;;  %v1149_v43 = vpop.f32.mrb[48].mxu0  ;;  %v1220_v33 = vpop.f32.mrb[48].mxu1 }
 0x2f9   :  { %v1150_v24 = vpop.f32.mrb[49].mxu0  ;;  %v1221_v31 = vpop.f32.mrb[49].mxu1 }
 0x2fa   :  { %v1050_v19 = vmul.f32 20.0, %v1027_v48  ;;  %v1151_v27 = vadd.f32 %v1150_v24, %v1149_v43  ;;  %v1222_v0 = vadd.f32 %v1221_v31, %v1220_v33 }
 0x2fc   :  { %1063 = vst [vmem:[#allocation8 + $0x50] sm:$0xff] %v1050_v19  ;;  %v1032_v35 = vadd.f32 %v1222_v0, %v1151_v27  ;;  %v1152_v49 = vpop.f32.mrb[50].mxu0  ;;  %v1223_v53 = vpop.f32.mrb[50].mxu1 }
 0x2fd   :  { %v1153_v2 = vpop.f32.mrb[51].mxu0  ;;  %v1224_v17 = vpop.f32.mrb[51].mxu1 }
 0x2fe   :  { %v1051_v52 = vmul.f32 20.0, %v1032_v35  ;;  %v1154_v6 = vadd.f32 %v1153_v2, %v1152_v49  ;;  %v1225_v46 = vadd.f32 %v1224_v17, %v1223_v53 }
 0x300   :  { %1064 = vst [vmem:[#allocation8 + $0x58] sm:$0xff] %v1051_v52  ;;  %v1037_v50 = vadd.f32 %v1225_v46, %v1154_v6 }
 0x302   :  { %v1052_v29 = vmul.f32 20.0, %v1037_v50 }
 0x304   :  { %1065 = vst [vmem:[#allocation8 + $0x60] sm:$0xff] %v1052_v29 }
 0x305   :  { %1531 = shalt.err (!%p1528_p0)
}
 0x306   :  { %s1532_s8 = scalar_lea.hbm %s1964_s4, 1664 }
 0x307   :  { %p1533_p1 = scmp.ne.s32.totalorder %s1964_s4, %s1532_s8  ;;  %p1536_p2 = scmp.lt.u32.totalorder %s1532_s8, %s1964_s4 }
 0x309   :  { %p1538_p3 = pnand %p1536_p2, %p1533_p1 }
 0x30b   :  { %1541 = shalt.err (!%p1538_p3)
}
 0x30c   :  { %1077 = dma.vmem_to_hbm [thread:$0]  %s1072_s30, 1664, %s1964_s4, [#allocation4], %s1555_s0, %s1555_s0, %s1556_s26  }
 0x30d   :  { %1546 = dma.done.wait [#allocation4], 1664  }
 0x30e   :  { %1547 = vsyncadd [#allocation4], 4294965632 }
 0x30f   :  { %1081 = vsyncpa [#allocation3], 1 }
 0x310   :  { %1082 = vsyncpa [#allocation6], 1 }
 0x311   :  { %1083 = vsyncpa [#allocation4], 1 }

</bundles_post_ra>
